<compile_context>
chip_gen: v7x
topology: tpu7x:2x2x1
jax: 0.10.0
libtpu: 0.0.40
codegen_flags: <defaults>
</compile_context>

<pallas_src>
import jax
import jax.numpy as jnp
from jax.experimental import pallas as pl
from jax.experimental.pallas import tpu as pltpu


def _leaky(x, slope=0.01):
    # nn.LeakyReLU default negative_slope = 0.01
    return jnp.where(x > 0, x, slope * x)


def msfn_gf_kernel(x_ref,
                   wir_ref, wiz_ref, win_ref,
                   whr_ref, whz_ref, whn_ref,
                   br_ref, bz_ref, bin_ref, bhn_ref,
                   w1_ref, w2_ref, w3_ref, b3_ref,
                   y_ref, h_state, h_blk):
    """One grid step == one block of T_BLK time steps.

    x_ref:   (T_BLK*B, 3H)  concatenated encoder outputs (row = t*B + b)
    wi*_ref: (3H, H)        per-gate W_ih^T  (r | z | n)
    wh*_ref: (H, H)         per-gate W_hh^T
    br/bz:   (1, H)         b_ih + b_hh for r / z gates (folded)
    bin/bhn: (1, H)         b_ih_n / b_hh_n (b_hh_n must stay inside r*(...))
    w1/w2:   (H, H)         projector Linear1/2 weight^T (no bias)
    w3:      (H, 1)         projector Linear3 weight^T
    b3:      (1, 1)         projector Linear3 bias
    y_ref:   (T_BLK*B, 1)   output rows for this block
    h_state: (B, H)         persistent GRU hidden state across blocks
    h_blk:   (T_BLK*B, H)   per-block hidden states (feeds batched projector)
    """
    blk = pl.program_id(0)
    B, H = h_state.shape
    t_blk = x_ref.shape[0] // B

    @pl.when(blk == 0)
    def _():
        h_state[...] = jnp.zeros_like(h_state)

    xb = x_ref[...].astype(jnp.float32)                      # (T_BLK*B, 3H)

    # Hoisted, block-parallel input projections (no dependence on h):
    # one batched matmul per gate instead of one per time step.
    gi_r = jnp.dot(xb, wir_ref[...], preferred_element_type=jnp.float32) + br_ref[...]
    gi_z = jnp.dot(xb, wiz_ref[...], preferred_element_type=jnp.float32) + bz_ref[...]
    gi_n = jnp.dot(xb, win_ref[...], preferred_element_type=jnp.float32) + bin_ref[...]

    whr = whr_ref[...]
    whz = whz_ref[...]
    whn = whn_ref[...]
    bhn = bhn_ref[...]

    # Serial GRU recurrence: only the tiny h @ W_hh matmuls remain on the
    # critical path. Statically unrolled over the time block.
    h = h_state[...]
    for t in range(t_blk):
        lo, hi = t * B, (t + 1) * B
        gh_r = jnp.dot(h, whr, preferred_element_type=jnp.float32)
        gh_z = jnp.dot(h, whz, preferred_element_type=jnp.float32)
        gh_n = jnp.dot(h, whn, preferred_element_type=jnp.float32) + bhn
        r = jax.nn.sigmoid(gi_r[lo:hi, :] + gh_r)
        z = jax.nn.sigmoid(gi_z[lo:hi, :] + gh_z)
        n = jnp.tanh(gi_n[lo:hi, :] + r * gh_n)
        h = (1.0 - z) * n + z * h
        h_blk[lo:hi, :] = h
    h_state[...] = h

    # Batched projector over the whole block (dropout = identity in eval):
    # Linear(no bias)->LeakyReLU -> Linear(no bias)->LeakyReLU -> Linear->LeakyReLU
    hb = h_blk[...]
    p = _leaky(jnp.dot(hb, w1_ref[...], preferred_element_type=jnp.float32))
    p = _leaky(jnp.dot(p, w2_ref[...], preferred_element_type=jnp.float32))
    y = _leaky(jnp.dot(p, w3_ref[...], preferred_element_type=jnp.float32) + b3_ref[...])
    y_ref[...] = y.astype(y_ref.dtype)


def msfn_gf_pallas(out_cat, params, t_blk=None):
    """out_cat: (T, B, 3H) concatenated encoder outputs. Returns (T, B, 1)."""
    T, B, F3 = out_cat.shape
    H = F3 // 3

    if t_blk is None:
        t_blk = T
    t_blk = min(t_blk, T)
    # Block rows must satisfy the 8-sublane rule unless the block spans all of T.
    if T % t_blk != 0 or (t_blk != T and (t_blk * B) % 8 != 0):
        t_blk = T
    n_blk = T // t_blk

    w_ih = params["w_ih"]                      # (3H, 3H), gate row order r|z|n
    w_hh = params["w_hh"]                      # (3H, H)
    b_ih = params["b_ih"]                      # (3H,)
    b_hh = params["b_hh"]                      # (3H,)

    # Pre-split per gate so the kernel never slices along the lane axis.
    wir = w_ih[0:H, :].T                       # (3H, H)
    wiz = w_ih[H:2 * H, :].T
    win = w_ih[2 * H:3 * H, :].T
    whr = w_hh[0:H, :].T                       # (H, H)
    whz = w_hh[H:2 * H, :].T
    whn = w_hh[2 * H:3 * H, :].T
    # b_hh_{r,z} fold into the hoisted input projection; b_hh_n stays inside r*(...).
    br = (b_ih[0:H] + b_hh[0:H]).reshape(1, H)
    bz = (b_ih[H:2 * H] + b_hh[H:2 * H]).reshape(1, H)
    bin_ = b_ih[2 * H:3 * H].reshape(1, H)
    bhn = b_hh[2 * H:3 * H].reshape(1, H)
    w1t = params["w1"].T                       # (H, H)
    w2t = params["w2"].T                       # (H, H)
    w3t = params["w3"].T                       # (H, 1)
    b3 = params["b3"].reshape(1, 1)

    # Wrapper-side layout plumbing: seq-major rows, row index = t*B + b.
    x2d = out_cat.reshape(T * B, F3).astype(jnp.float32)

    def full_spec(arr):
        nd = arr.ndim
        return pl.BlockSpec(arr.shape, lambda i, _n=nd: (0,) * _n)

    weights = (wir, wiz, win, whr, whz, whn, br, bz, bin_, bhn, w1t, w2t, w3t, b3)
    in_specs = [pl.BlockSpec((t_blk * B, F3), lambda i: (i, 0))]
    in_specs += [full_spec(w) for w in weights]
    out_spec = pl.BlockSpec((t_blk * B, 1), lambda i: (i, 0))

    y2d = pl.pallas_call(
        msfn_gf_kernel,
        out_shape=jax.ShapeDtypeStruct((T * B, 1), jnp.float32),
        grid=(n_blk,),
        in_specs=in_specs,
        out_specs=out_spec,
        scratch_shapes=[
            pltpu.VMEM((B, H), jnp.float32),           # persistent GRU state
            pltpu.VMEM((t_blk * B, H), jnp.float32),   # per-block hidden states
        ],
        compiler_params=pltpu.CompilerParams(
            dimension_semantics=("arbitrary",)),        # GRU recurrence is sequential
    )(x2d, *weights)

    return y2d.reshape(T, B, 1)


def msfn_gf_reference(out_cat, params):
    """Pure-JAX reference (mirrors PyTorch GRU + projector) for verification."""
    H = params["w_hh"].shape[1]
    B = out_cat.shape[1]

    def step(h, x_t):
        gi = x_t @ params["w_ih"].T + params["b_ih"]
        gh = h @ params["w_hh"].T + params["b_hh"]
        r = jax.nn.sigmoid(gi[:, :H] + gh[:, :H])
        z = jax.nn.sigmoid(gi[:, H:2 * H] + gh[:, H:2 * H])
        n = jnp.tanh(gi[:, 2 * H:] + r * gh[:, 2 * H:])
        h_new = (1.0 - z) * n + z * h
        return h_new, h_new

    h0 = jnp.zeros((B, H), jnp.float32)
    _, hs = jax.lax.scan(step, h0, out_cat)              # (T, B, H)
    y = _leaky(hs @ params["w1"].T)
    y = _leaky(y @ params["w2"].T)
    y = _leaky(y @ params["w3"].T + params["b3"])
    return y


if __name__ == "__main__":
    B, T, H = 2, 8, 32   # batch, seq, n_hidden

    key = jax.random.PRNGKey(0)
    keys = jax.random.split(key, 16)

    # Inputs as the PyTorch module receives them: batch-first (B, T, H);
    # forward transposes to seq-first before the encoders / GRU.
    x_1 = jax.random.normal(keys[0], (B, T, H), jnp.float32)
    x_2 = jax.random.normal(keys[1], (B, T, H), jnp.float32)
    x_3 = jax.random.normal(keys[2], (B, T, H), jnp.float32)

    # Deterministic synthetic parameters.
    s = 0.1
    enc1_w = s * jax.random.normal(keys[3], (H, H), jnp.float32)
    enc2_w = s * jax.random.normal(keys[4], (H, H), jnp.float32)
    enc3_w = s * jax.random.normal(keys[5], (H, H), jnp.float32)
    params = {
        "w_ih": s * jax.random.normal(keys[6], (3 * H, 3 * H), jnp.float32),  # GRU W_ih
        "w_hh": s * jax.random.normal(keys[7], (3 * H, H), jnp.float32),      # GRU W_hh
        "b_ih": s * jax.random.normal(keys[8], (3 * H,), jnp.float32),
        "b_hh": s * jax.random.normal(keys[9], (3 * H,), jnp.float32),
        "w1": s * jax.random.normal(keys[10], (H, H), jnp.float32),   # Linear(H,H,bias=False)
        "w2": s * jax.random.normal(keys[11], (H, H), jnp.float32),   # Linear(H,H,bias=False)
        "w3": s * jax.random.normal(keys[12], (1, H), jnp.float32),   # Linear(H,1,bias=True)
        "b3": s * jax.random.normal(keys[13], (1,), jnp.float32),
    }

    # ---- glue: x.transpose(0,1) + external encoders + concat (plain JAX) ----
    x1_t = jnp.transpose(x_1, (1, 0, 2))   # (T, B, H)
    x2_t = jnp.transpose(x_2, (1, 0, 2))
    x3_t = jnp.transpose(x_3, (1, 0, 2))
    out_1 = jnp.tanh(x1_t @ enc1_w.T)      # encoder1 -> (state, output_1)
    out_2 = jnp.tanh(x2_t @ enc2_w.T)      # encoder2 -> output_2
    out_3 = jnp.tanh(x3_t @ enc3_w.T)      # encoder3 -> (state, output_3)
    out_cat = jnp.concatenate([out_1, out_2, out_3], axis=2)   # (T, B, 3H)

    # ---- Pallas kernel: hoisted input projection + GRU recurrence + projector ----
    y = msfn_gf_pallas(out_cat, params)
    y = jax.block_until_ready(y)

    y_ref = jax.block_until_ready(msfn_gf_reference(out_cat, params))
    assert y.shape == (T, B, 1)
    assert jnp.allclose(y, y_ref, atol=1e-5, rtol=1e-4), (
        f"max err {jnp.max(jnp.abs(y - y_ref))}")

    print("KERNEL_OK")
</pallas_src>

<mosaic_0001>
module attributes {stable_mosaic.version = 11 : i64} {
  func.func @msfn_gf_kernel(%arg0: i32, %arg1: memref<16x96xf32, #tpu.memory_space<vmem>>, %arg2: memref<96x32xf32, #tpu.memory_space<vmem>>, %arg3: memref<96x32xf32, #tpu.memory_space<vmem>>, %arg4: memref<96x32xf32, #tpu.memory_space<vmem>>, %arg5: memref<32x32xf32, #tpu.memory_space<vmem>>, %arg6: memref<32x32xf32, #tpu.memory_space<vmem>>, %arg7: memref<32x32xf32, #tpu.memory_space<vmem>>, %arg8: memref<1x32xf32, #tpu.memory_space<vmem>>, %arg9: memref<1x32xf32, #tpu.memory_space<vmem>>, %arg10: memref<1x32xf32, #tpu.memory_space<vmem>>, %arg11: memref<1x32xf32, #tpu.memory_space<vmem>>, %arg12: memref<32x32xf32, #tpu.memory_space<vmem>>, %arg13: memref<32x32xf32, #tpu.memory_space<vmem>>, %arg14: memref<32x1xf32, #tpu.memory_space<vmem>>, %arg15: memref<1x1xf32, #tpu.memory_space<vmem>>, %arg16: memref<16x1xf32, #tpu.memory_space<vmem>>, %arg17: memref<2x32xf32, #tpu.memory_space<vmem>>, %arg18: memref<16x32xf32, #tpu.memory_space<vmem>>) attributes {dimension_semantics = [#tpu.dimension_semantics<arbitrary>], iteration_bounds = array<i64: 1>, scalar_prefetch = 0 : i64, scratch_operands = 2 : i64, tpu.core_type = #tpu.core_type<tc>, window_params = [{transform_indices = @transform_0, window_bounds = array<i64: 16, 96>}, {pipeline_mode = #tpu.pipeline_mode<synchronous>, transform_indices = @transform_1, window_bounds = array<i64: 96, 32>}, {pipeline_mode = #tpu.pipeline_mode<synchronous>, transform_indices = @transform_2, window_bounds = array<i64: 96, 32>}, {pipeline_mode = #tpu.pipeline_mode<synchronous>, transform_indices = @transform_3, window_bounds = array<i64: 96, 32>}, {pipeline_mode = #tpu.pipeline_mode<synchronous>, transform_indices = @transform_4, window_bounds = array<i64: 32, 32>}, {pipeline_mode = #tpu.pipeline_mode<synchronous>, transform_indices = @transform_5, window_bounds = array<i64: 32, 32>}, {pipeline_mode = #tpu.pipeline_mode<synchronous>, transform_indices = @transform_6, window_bounds = array<i64: 32, 32>}, {pipeline_mode = #tpu.pipeline_mode<synchronous>, transform_indices = @transform_7, window_bounds = array<i64: 1, 32>}, {pipeline_mode = #tpu.pipeline_mode<synchronous>, transform_indices = @transform_8, window_bounds = array<i64: 1, 32>}, {pipeline_mode = #tpu.pipeline_mode<synchronous>, transform_indices = @transform_9, window_bounds = array<i64: 1, 32>}, {pipeline_mode = #tpu.pipeline_mode<synchronous>, transform_indices = @transform_10, window_bounds = array<i64: 1, 32>}, {pipeline_mode = #tpu.pipeline_mode<synchronous>, transform_indices = @transform_11, window_bounds = array<i64: 32, 32>}, {pipeline_mode = #tpu.pipeline_mode<synchronous>, transform_indices = @transform_12, window_bounds = array<i64: 32, 32>}, {pipeline_mode = #tpu.pipeline_mode<synchronous>, transform_indices = @transform_13, window_bounds = array<i64: 32, 1>}, {pipeline_mode = #tpu.pipeline_mode<synchronous>, transform_indices = @transform_14, window_bounds = array<i64: 1, 1>}, {transform_indices = @transform_15, window_bounds = array<i64: 16, 1>}]} {
    %c0_i32 = arith.constant 0 : i32
    %0 = arith.cmpi eq, %arg0, %c0_i32 : i32
    %1 = arith.extui %0 : i1 to i32
    %c0_i32_0 = arith.constant 0 : i32
    %2 = arith.cmpi ne, %1, %c0_i32_0 : i32
    scf.if %2 {
      %cst_106 = arith.constant 0.000000e+00 : f32
      %283 = vector.broadcast %cst_106 : f32 to vector<2x32xf32>
      %c0_107 = arith.constant 0 : index
      %c0_108 = arith.constant 0 : index
      %284 = vector.load %arg17[%c0_107, %c0_108] : memref<2x32xf32, #tpu.memory_space<vmem>>, vector<2x32xf32>
      tpu.vector_store %arg17[%c0_107, %c0_108], %283 {strides = array<i32>} : memref<2x32xf32, #tpu.memory_space<vmem>>, vector<2x32xf32>,
    } else {
    }
    %c0 = arith.constant 0 : index
    %c0_1 = arith.constant 0 : index
    %3 = vector.load %arg1[%c0, %c0_1] : memref<16x96xf32, #tpu.memory_space<vmem>>, vector<16x96xf32>
    %c0_2 = arith.constant 0 : index
    %c0_3 = arith.constant 0 : index
    %4 = vector.load %arg2[%c0_2, %c0_3] : memref<96x32xf32, #tpu.memory_space<vmem>>, vector<96x32xf32>
    %cst = arith.constant dense<0.000000e+00> : vector<16x32xf32>
    %5 = tpu.matmul %3, %4, %cst {dimension_numbers = #tpu.dot_dimension_numbers<[1], [0], [0], [1], [0, 0, 1, 1], [], []>} : vector<16x96xf32>, vector<96x32xf32>, vector<16x32xf32> -> vector<16x32xf32>
    %c0_4 = arith.constant 0 : index
    %c0_5 = arith.constant 0 : index
    %6 = vector.load %arg8[%c0_4, %c0_5] : memref<1x32xf32, #tpu.memory_space<vmem>>, vector<1x32xf32>
    %7 = vector.broadcast %6 : vector<1x32xf32> to vector<16x32xf32>
    %8 = arith.addf %5, %7 : vector<16x32xf32>
    %c0_6 = arith.constant 0 : index
    %c0_7 = arith.constant 0 : index
    %9 = vector.load %arg3[%c0_6, %c0_7] : memref<96x32xf32, #tpu.memory_space<vmem>>, vector<96x32xf32>
    %cst_8 = arith.constant dense<0.000000e+00> : vector<16x32xf32>
    %10 = tpu.matmul %3, %9, %cst_8 {dimension_numbers = #tpu.dot_dimension_numbers<[1], [0], [0], [1], [0, 0, 1, 1], [], []>} : vector<16x96xf32>, vector<96x32xf32>, vector<16x32xf32> -> vector<16x32xf32>
    %c0_9 = arith.constant 0 : index
    %c0_10 = arith.constant 0 : index
    %11 = vector.load %arg9[%c0_9, %c0_10] : memref<1x32xf32, #tpu.memory_space<vmem>>, vector<1x32xf32>
    %12 = vector.broadcast %11 : vector<1x32xf32> to vector<16x32xf32>
    %13 = arith.addf %10, %12 : vector<16x32xf32>
    %c0_11 = arith.constant 0 : index
    %c0_12 = arith.constant 0 : index
    %14 = vector.load %arg4[%c0_11, %c0_12] : memref<96x32xf32, #tpu.memory_space<vmem>>, vector<96x32xf32>
    %cst_13 = arith.constant dense<0.000000e+00> : vector<16x32xf32>
    %15 = tpu.matmul %3, %14, %cst_13 {dimension_numbers = #tpu.dot_dimension_numbers<[1], [0], [0], [1], [0, 0, 1, 1], [], []>} : vector<16x96xf32>, vector<96x32xf32>, vector<16x32xf32> -> vector<16x32xf32>
    %c0_14 = arith.constant 0 : index
    %c0_15 = arith.constant 0 : index
    %16 = vector.load %arg10[%c0_14, %c0_15] : memref<1x32xf32, #tpu.memory_space<vmem>>, vector<1x32xf32>
    %17 = vector.broadcast %16 : vector<1x32xf32> to vector<16x32xf32>
    %18 = arith.addf %15, %17 : vector<16x32xf32>
    %c0_16 = arith.constant 0 : index
    %c0_17 = arith.constant 0 : index
    %19 = vector.load %arg5[%c0_16, %c0_17] : memref<32x32xf32, #tpu.memory_space<vmem>>, vector<32x32xf32>
    %c0_18 = arith.constant 0 : index
    %c0_19 = arith.constant 0 : index
    %20 = vector.load %arg6[%c0_18, %c0_19] : memref<32x32xf32, #tpu.memory_space<vmem>>, vector<32x32xf32>
    %c0_20 = arith.constant 0 : index
    %c0_21 = arith.constant 0 : index
    %21 = vector.load %arg7[%c0_20, %c0_21] : memref<32x32xf32, #tpu.memory_space<vmem>>, vector<32x32xf32>
    %c0_22 = arith.constant 0 : index
    %c0_23 = arith.constant 0 : index
    %22 = vector.load %arg11[%c0_22, %c0_23] : memref<1x32xf32, #tpu.memory_space<vmem>>, vector<1x32xf32>
    %c0_24 = arith.constant 0 : index
    %c0_25 = arith.constant 0 : index
    %23 = vector.load %arg17[%c0_24, %c0_25] : memref<2x32xf32, #tpu.memory_space<vmem>>, vector<2x32xf32>
    %cst_26 = arith.constant dense<0.000000e+00> : vector<2x32xf32>
    %24 = tpu.matmul %23, %19, %cst_26 {dimension_numbers = #tpu.dot_dimension_numbers<[1], [0], [0], [1], [0, 0, 1, 1], [], []>} : vector<2x32xf32>, vector<32x32xf32>, vector<2x32xf32> -> vector<2x32xf32>
    %cst_27 = arith.constant dense<0.000000e+00> : vector<2x32xf32>
    %25 = tpu.matmul %23, %20, %cst_27 {dimension_numbers = #tpu.dot_dimension_numbers<[1], [0], [0], [1], [0, 0, 1, 1], [], []>} : vector<2x32xf32>, vector<32x32xf32>, vector<2x32xf32> -> vector<2x32xf32>
    %cst_28 = arith.constant dense<0.000000e+00> : vector<2x32xf32>
    %26 = tpu.matmul %23, %21, %cst_28 {dimension_numbers = #tpu.dot_dimension_numbers<[1], [0], [0], [1], [0, 0, 1, 1], [], []>} : vector<2x32xf32>, vector<32x32xf32>, vector<2x32xf32> -> vector<2x32xf32>
    %27 = vector.broadcast %22 : vector<1x32xf32> to vector<2x32xf32>
    %28 = arith.addf %26, %27 : vector<2x32xf32>
    %29 = vector.extract_strided_slice %8 {offsets = [0, 0], sizes = [2, 32], strides = [1, 1]} : vector<16x32xf32> to vector<2x32xf32>
    %30 = arith.addf %29, %24 : vector<2x32xf32>
    %31 = arith.negf %30 : vector<2x32xf32>
    %32 = math.exp %31 : vector<2x32xf32>
    %cst_29 = arith.constant 1.000000e+00 : f32
    %33 = vector.broadcast %cst_29 : f32 to vector<2x32xf32>
    %34 = arith.addf %33, %32 : vector<2x32xf32>
    %35 = arith.divf %33, %34 : vector<2x32xf32>
    %36 = vector.extract_strided_slice %13 {offsets = [0, 0], sizes = [2, 32], strides = [1, 1]} : vector<16x32xf32> to vector<2x32xf32>
    %37 = arith.addf %36, %25 : vector<2x32xf32>
    %38 = arith.negf %37 : vector<2x32xf32>
    %39 = math.exp %38 : vector<2x32xf32>
    %cst_30 = arith.constant 1.000000e+00 : f32
    %40 = vector.broadcast %cst_30 : f32 to vector<2x32xf32>
    %41 = arith.addf %40, %39 : vector<2x32xf32>
    %42 = arith.divf %40, %41 : vector<2x32xf32>
    %43 = vector.extract_strided_slice %18 {offsets = [0, 0], sizes = [2, 32], strides = [1, 1]} : vector<16x32xf32> to vector<2x32xf32>
    %44 = arith.mulf %35, %28 : vector<2x32xf32>
    %45 = arith.addf %43, %44 : vector<2x32xf32>
    %46 = math.tanh %45 : vector<2x32xf32>
    %cst_31 = arith.constant 1.000000e+00 : f32
    %47 = vector.broadcast %cst_31 : f32 to vector<2x32xf32>
    %48 = arith.subf %47, %42 : vector<2x32xf32>
    %49 = arith.mulf %48, %46 : vector<2x32xf32>
    %50 = arith.mulf %42, %23 : vector<2x32xf32>
    %51 = arith.addf %49, %50 : vector<2x32xf32>
    %c0_32 = arith.constant 0 : index
    %c0_33 = arith.constant 0 : index
    %52 = vector.load %arg18[%c0_32, %c0_33] : memref<16x32xf32, #tpu.memory_space<vmem>>, vector<2x32xf32>
    tpu.vector_store %arg18[%c0_32, %c0_33], %51 {strides = array<i32>} : memref<16x32xf32, #tpu.memory_space<vmem>>, vector<2x32xf32>,
    %cst_34 = arith.constant dense<0.000000e+00> : vector<2x32xf32>
    %53 = tpu.matmul %51, %19, %cst_34 {dimension_numbers = #tpu.dot_dimension_numbers<[1], [0], [0], [1], [0, 0, 1, 1], [], []>} : vector<2x32xf32>, vector<32x32xf32>, vector<2x32xf32> -> vector<2x32xf32>
    %cst_35 = arith.constant dense<0.000000e+00> : vector<2x32xf32>
    %54 = tpu.matmul %51, %20, %cst_35 {dimension_numbers = #tpu.dot_dimension_numbers<[1], [0], [0], [1], [0, 0, 1, 1], [], []>} : vector<2x32xf32>, vector<32x32xf32>, vector<2x32xf32> -> vector<2x32xf32>
    %cst_36 = arith.constant dense<0.000000e+00> : vector<2x32xf32>
    %55 = tpu.matmul %51, %21, %cst_36 {dimension_numbers = #tpu.dot_dimension_numbers<[1], [0], [0], [1], [0, 0, 1, 1], [], []>} : vector<2x32xf32>, vector<32x32xf32>, vector<2x32xf32> -> vector<2x32xf32>
    %56 = vector.broadcast %22 : vector<1x32xf32> to vector<2x32xf32>
    %57 = arith.addf %55, %56 : vector<2x32xf32>
    %58 = vector.extract_strided_slice %8 {offsets = [2, 0], sizes = [2, 32], strides = [1, 1]} : vector<16x32xf32> to vector<2x32xf32>
    %59 = arith.addf %58, %53 : vector<2x32xf32>
    %60 = arith.negf %59 : vector<2x32xf32>
    %61 = math.exp %60 : vector<2x32xf32>
    %cst_37 = arith.constant 1.000000e+00 : f32
    %62 = vector.broadcast %cst_37 : f32 to vector<2x32xf32>
    %63 = arith.addf %62, %61 : vector<2x32xf32>
    %64 = arith.divf %62, %63 : vector<2x32xf32>
    %65 = vector.extract_strided_slice %13 {offsets = [2, 0], sizes = [2, 32], strides = [1, 1]} : vector<16x32xf32> to vector<2x32xf32>
    %66 = arith.addf %65, %54 : vector<2x32xf32>
    %67 = arith.negf %66 : vector<2x32xf32>
    %68 = math.exp %67 : vector<2x32xf32>
    %cst_38 = arith.constant 1.000000e+00 : f32
    %69 = vector.broadcast %cst_38 : f32 to vector<2x32xf32>
    %70 = arith.addf %69, %68 : vector<2x32xf32>
    %71 = arith.divf %69, %70 : vector<2x32xf32>
    %72 = vector.extract_strided_slice %18 {offsets = [2, 0], sizes = [2, 32], strides = [1, 1]} : vector<16x32xf32> to vector<2x32xf32>
    %73 = arith.mulf %64, %57 : vector<2x32xf32>
    %74 = arith.addf %72, %73 : vector<2x32xf32>
    %75 = math.tanh %74 : vector<2x32xf32>
    %cst_39 = arith.constant 1.000000e+00 : f32
    %76 = vector.broadcast %cst_39 : f32 to vector<2x32xf32>
    %77 = arith.subf %76, %71 : vector<2x32xf32>
    %78 = arith.mulf %77, %75 : vector<2x32xf32>
    %79 = arith.mulf %71, %51 : vector<2x32xf32>
    %80 = arith.addf %78, %79 : vector<2x32xf32>
    %c2 = arith.constant 2 : index
    %c0_40 = arith.constant 0 : index
    %81 = vector.load %arg18[%c2, %c0_40] : memref<16x32xf32, #tpu.memory_space<vmem>>, vector<2x32xf32>
    tpu.vector_store %arg18[%c2, %c0_40], %80 {strides = array<i32>} : memref<16x32xf32, #tpu.memory_space<vmem>>, vector<2x32xf32>,
    %cst_41 = arith.constant dense<0.000000e+00> : vector<2x32xf32>
    %82 = tpu.matmul %80, %19, %cst_41 {dimension_numbers = #tpu.dot_dimension_numbers<[1], [0], [0], [1], [0, 0, 1, 1], [], []>} : vector<2x32xf32>, vector<32x32xf32>, vector<2x32xf32> -> vector<2x32xf32>
    %cst_42 = arith.constant dense<0.000000e+00> : vector<2x32xf32>
    %83 = tpu.matmul %80, %20, %cst_42 {dimension_numbers = #tpu.dot_dimension_numbers<[1], [0], [0], [1], [0, 0, 1, 1], [], []>} : vector<2x32xf32>, vector<32x32xf32>, vector<2x32xf32> -> vector<2x32xf32>
    %cst_43 = arith.constant dense<0.000000e+00> : vector<2x32xf32>
    %84 = tpu.matmul %80, %21, %cst_43 {dimension_numbers = #tpu.dot_dimension_numbers<[1], [0], [0], [1], [0, 0, 1, 1], [], []>} : vector<2x32xf32>, vector<32x32xf32>, vector<2x32xf32> -> vector<2x32xf32>
    %85 = vector.broadcast %22 : vector<1x32xf32> to vector<2x32xf32>
    %86 = arith.addf %84, %85 : vector<2x32xf32>
    %87 = vector.extract_strided_slice %8 {offsets = [4, 0], sizes = [2, 32], strides = [1, 1]} : vector<16x32xf32> to vector<2x32xf32>
    %88 = arith.addf %87, %82 : vector<2x32xf32>
    %89 = arith.negf %88 : vector<2x32xf32>
    %90 = math.exp %89 : vector<2x32xf32>
    %cst_44 = arith.constant 1.000000e+00 : f32
    %91 = vector.broadcast %cst_44 : f32 to vector<2x32xf32>
    %92 = arith.addf %91, %90 : vector<2x32xf32>
    %93 = arith.divf %91, %92 : vector<2x32xf32>
    %94 = vector.extract_strided_slice %13 {offsets = [4, 0], sizes = [2, 32], strides = [1, 1]} : vector<16x32xf32> to vector<2x32xf32>
    %95 = arith.addf %94, %83 : vector<2x32xf32>
    %96 = arith.negf %95 : vector<2x32xf32>
    %97 = math.exp %96 : vector<2x32xf32>
    %cst_45 = arith.constant 1.000000e+00 : f32
    %98 = vector.broadcast %cst_45 : f32 to vector<2x32xf32>
    %99 = arith.addf %98, %97 : vector<2x32xf32>
    %100 = arith.divf %98, %99 : vector<2x32xf32>
    %101 = vector.extract_strided_slice %18 {offsets = [4, 0], sizes = [2, 32], strides = [1, 1]} : vector<16x32xf32> to vector<2x32xf32>
    %102 = arith.mulf %93, %86 : vector<2x32xf32>
    %103 = arith.addf %101, %102 : vector<2x32xf32>
    %104 = math.tanh %103 : vector<2x32xf32>
    %cst_46 = arith.constant 1.000000e+00 : f32
    %105 = vector.broadcast %cst_46 : f32 to vector<2x32xf32>
    %106 = arith.subf %105, %100 : vector<2x32xf32>
    %107 = arith.mulf %106, %104 : vector<2x32xf32>
    %108 = arith.mulf %100, %80 : vector<2x32xf32>
    %109 = arith.addf %107, %108 : vector<2x32xf32>
    %c4 = arith.constant 4 : index
    %c0_47 = arith.constant 0 : index
    %110 = vector.load %arg18[%c4, %c0_47] : memref<16x32xf32, #tpu.memory_space<vmem>>, vector<2x32xf32>
    tpu.vector_store %arg18[%c4, %c0_47], %109 {strides = array<i32>} : memref<16x32xf32, #tpu.memory_space<vmem>>, vector<2x32xf32>,
    %cst_48 = arith.constant dense<0.000000e+00> : vector<2x32xf32>
    %111 = tpu.matmul %109, %19, %cst_48 {dimension_numbers = #tpu.dot_dimension_numbers<[1], [0], [0], [1], [0, 0, 1, 1], [], []>} : vector<2x32xf32>, vector<32x32xf32>, vector<2x32xf32> -> vector<2x32xf32>
    %cst_49 = arith.constant dense<0.000000e+00> : vector<2x32xf32>
    %112 = tpu.matmul %109, %20, %cst_49 {dimension_numbers = #tpu.dot_dimension_numbers<[1], [0], [0], [1], [0, 0, 1, 1], [], []>} : vector<2x32xf32>, vector<32x32xf32>, vector<2x32xf32> -> vector<2x32xf32>
    %cst_50 = arith.constant dense<0.000000e+00> : vector<2x32xf32>
    %113 = tpu.matmul %109, %21, %cst_50 {dimension_numbers = #tpu.dot_dimension_numbers<[1], [0], [0], [1], [0, 0, 1, 1], [], []>} : vector<2x32xf32>, vector<32x32xf32>, vector<2x32xf32> -> vector<2x32xf32>
    %114 = vector.broadcast %22 : vector<1x32xf32> to vector<2x32xf32>
    %115 = arith.addf %113, %114 : vector<2x32xf32>
    %116 = vector.extract_strided_slice %8 {offsets = [6, 0], sizes = [2, 32], strides = [1, 1]} : vector<16x32xf32> to vector<2x32xf32>
    %117 = arith.addf %116, %111 : vector<2x32xf32>
    %118 = arith.negf %117 : vector<2x32xf32>
    %119 = math.exp %118 : vector<2x32xf32>
    %cst_51 = arith.constant 1.000000e+00 : f32
    %120 = vector.broadcast %cst_51 : f32 to vector<2x32xf32>
    %121 = arith.addf %120, %119 : vector<2x32xf32>
    %122 = arith.divf %120, %121 : vector<2x32xf32>
    %123 = vector.extract_strided_slice %13 {offsets = [6, 0], sizes = [2, 32], strides = [1, 1]} : vector<16x32xf32> to vector<2x32xf32>
    %124 = arith.addf %123, %112 : vector<2x32xf32>
    %125 = arith.negf %124 : vector<2x32xf32>
    %126 = math.exp %125 : vector<2x32xf32>
    %cst_52 = arith.constant 1.000000e+00 : f32
    %127 = vector.broadcast %cst_52 : f32 to vector<2x32xf32>
    %128 = arith.addf %127, %126 : vector<2x32xf32>
    %129 = arith.divf %127, %128 : vector<2x32xf32>
    %130 = vector.extract_strided_slice %18 {offsets = [6, 0], sizes = [2, 32], strides = [1, 1]} : vector<16x32xf32> to vector<2x32xf32>
    %131 = arith.mulf %122, %115 : vector<2x32xf32>
    %132 = arith.addf %130, %131 : vector<2x32xf32>
    %133 = math.tanh %132 : vector<2x32xf32>
    %cst_53 = arith.constant 1.000000e+00 : f32
    %134 = vector.broadcast %cst_53 : f32 to vector<2x32xf32>
    %135 = arith.subf %134, %129 : vector<2x32xf32>
    %136 = arith.mulf %135, %133 : vector<2x32xf32>
    %137 = arith.mulf %129, %109 : vector<2x32xf32>
    %138 = arith.addf %136, %137 : vector<2x32xf32>
    %c6 = arith.constant 6 : index
    %c0_54 = arith.constant 0 : index
    %139 = vector.load %arg18[%c6, %c0_54] : memref<16x32xf32, #tpu.memory_space<vmem>>, vector<2x32xf32>
    tpu.vector_store %arg18[%c6, %c0_54], %138 {strides = array<i32>} : memref<16x32xf32, #tpu.memory_space<vmem>>, vector<2x32xf32>,
    %cst_55 = arith.constant dense<0.000000e+00> : vector<2x32xf32>
    %140 = tpu.matmul %138, %19, %cst_55 {dimension_numbers = #tpu.dot_dimension_numbers<[1], [0], [0], [1], [0, 0, 1, 1], [], []>} : vector<2x32xf32>, vector<32x32xf32>, vector<2x32xf32> -> vector<2x32xf32>
    %cst_56 = arith.constant dense<0.000000e+00> : vector<2x32xf32>
    %141 = tpu.matmul %138, %20, %cst_56 {dimension_numbers = #tpu.dot_dimension_numbers<[1], [0], [0], [1], [0, 0, 1, 1], [], []>} : vector<2x32xf32>, vector<32x32xf32>, vector<2x32xf32> -> vector<2x32xf32>
    %cst_57 = arith.constant dense<0.000000e+00> : vector<2x32xf32>
    %142 = tpu.matmul %138, %21, %cst_57 {dimension_numbers = #tpu.dot_dimension_numbers<[1], [0], [0], [1], [0, 0, 1, 1], [], []>} : vector<2x32xf32>, vector<32x32xf32>, vector<2x32xf32> -> vector<2x32xf32>
    %143 = vector.broadcast %22 : vector<1x32xf32> to vector<2x32xf32>
    %144 = arith.addf %142, %143 : vector<2x32xf32>
    %145 = vector.extract_strided_slice %8 {offsets = [8, 0], sizes = [2, 32], strides = [1, 1]} : vector<16x32xf32> to vector<2x32xf32>
    %146 = arith.addf %145, %140 : vector<2x32xf32>
    %147 = arith.negf %146 : vector<2x32xf32>
    %148 = math.exp %147 : vector<2x32xf32>
    %cst_58 = arith.constant 1.000000e+00 : f32
    %149 = vector.broadcast %cst_58 : f32 to vector<2x32xf32>
    %150 = arith.addf %149, %148 : vector<2x32xf32>
    %151 = arith.divf %149, %150 : vector<2x32xf32>
    %152 = vector.extract_strided_slice %13 {offsets = [8, 0], sizes = [2, 32], strides = [1, 1]} : vector<16x32xf32> to vector<2x32xf32>
    %153 = arith.addf %152, %141 : vector<2x32xf32>
    %154 = arith.negf %153 : vector<2x32xf32>
    %155 = math.exp %154 : vector<2x32xf32>
    %cst_59 = arith.constant 1.000000e+00 : f32
    %156 = vector.broadcast %cst_59 : f32 to vector<2x32xf32>
    %157 = arith.addf %156, %155 : vector<2x32xf32>
    %158 = arith.divf %156, %157 : vector<2x32xf32>
    %159 = vector.extract_strided_slice %18 {offsets = [8, 0], sizes = [2, 32], strides = [1, 1]} : vector<16x32xf32> to vector<2x32xf32>
    %160 = arith.mulf %151, %144 : vector<2x32xf32>
    %161 = arith.addf %159, %160 : vector<2x32xf32>
    %162 = math.tanh %161 : vector<2x32xf32>
    %cst_60 = arith.constant 1.000000e+00 : f32
    %163 = vector.broadcast %cst_60 : f32 to vector<2x32xf32>
    %164 = arith.subf %163, %158 : vector<2x32xf32>
    %165 = arith.mulf %164, %162 : vector<2x32xf32>
    %166 = arith.mulf %158, %138 : vector<2x32xf32>
    %167 = arith.addf %165, %166 : vector<2x32xf32>
    %c8 = arith.constant 8 : index
    %c0_61 = arith.constant 0 : index
    %168 = vector.load %arg18[%c8, %c0_61] : memref<16x32xf32, #tpu.memory_space<vmem>>, vector<2x32xf32>
    tpu.vector_store %arg18[%c8, %c0_61], %167 {strides = array<i32>} : memref<16x32xf32, #tpu.memory_space<vmem>>, vector<2x32xf32>,
    %cst_62 = arith.constant dense<0.000000e+00> : vector<2x32xf32>
    %169 = tpu.matmul %167, %19, %cst_62 {dimension_numbers = #tpu.dot_dimension_numbers<[1], [0], [0], [1], [0, 0, 1, 1], [], []>} : vector<2x32xf32>, vector<32x32xf32>, vector<2x32xf32> -> vector<2x32xf32>
    %cst_63 = arith.constant dense<0.000000e+00> : vector<2x32xf32>
    %170 = tpu.matmul %167, %20, %cst_63 {dimension_numbers = #tpu.dot_dimension_numbers<[1], [0], [0], [1], [0, 0, 1, 1], [], []>} : vector<2x32xf32>, vector<32x32xf32>, vector<2x32xf32> -> vector<2x32xf32>
    %cst_64 = arith.constant dense<0.000000e+00> : vector<2x32xf32>
    %171 = tpu.matmul %167, %21, %cst_64 {dimension_numbers = #tpu.dot_dimension_numbers<[1], [0], [0], [1], [0, 0, 1, 1], [], []>} : vector<2x32xf32>, vector<32x32xf32>, vector<2x32xf32> -> vector<2x32xf32>
    %172 = vector.broadcast %22 : vector<1x32xf32> to vector<2x32xf32>
    %173 = arith.addf %171, %172 : vector<2x32xf32>
    %174 = vector.extract_strided_slice %8 {offsets = [10, 0], sizes = [2, 32], strides = [1, 1]} : vector<16x32xf32> to vector<2x32xf32>
    %175 = arith.addf %174, %169 : vector<2x32xf32>
    %176 = arith.negf %175 : vector<2x32xf32>
    %177 = math.exp %176 : vector<2x32xf32>
    %cst_65 = arith.constant 1.000000e+00 : f32
    %178 = vector.broadcast %cst_65 : f32 to vector<2x32xf32>
    %179 = arith.addf %178, %177 : vector<2x32xf32>
    %180 = arith.divf %178, %179 : vector<2x32xf32>
    %181 = vector.extract_strided_slice %13 {offsets = [10, 0], sizes = [2, 32], strides = [1, 1]} : vector<16x32xf32> to vector<2x32xf32>
    %182 = arith.addf %181, %170 : vector<2x32xf32>
    %183 = arith.negf %182 : vector<2x32xf32>
    %184 = math.exp %183 : vector<2x32xf32>
    %cst_66 = arith.constant 1.000000e+00 : f32
    %185 = vector.broadcast %cst_66 : f32 to vector<2x32xf32>
    %186 = arith.addf %185, %184 : vector<2x32xf32>
    %187 = arith.divf %185, %186 : vector<2x32xf32>
    %188 = vector.extract_strided_slice %18 {offsets = [10, 0], sizes = [2, 32], strides = [1, 1]} : vector<16x32xf32> to vector<2x32xf32>
    %189 = arith.mulf %180, %173 : vector<2x32xf32>
    %190 = arith.addf %188, %189 : vector<2x32xf32>
    %191 = math.tanh %190 : vector<2x32xf32>
    %cst_67 = arith.constant 1.000000e+00 : f32
    %192 = vector.broadcast %cst_67 : f32 to vector<2x32xf32>
    %193 = arith.subf %192, %187 : vector<2x32xf32>
    %194 = arith.mulf %193, %191 : vector<2x32xf32>
    %195 = arith.mulf %187, %167 : vector<2x32xf32>
    %196 = arith.addf %194, %195 : vector<2x32xf32>
    %c10 = arith.constant 10 : index
    %c0_68 = arith.constant 0 : index
    %197 = vector.load %arg18[%c10, %c0_68] : memref<16x32xf32, #tpu.memory_space<vmem>>, vector<2x32xf32>
    tpu.vector_store %arg18[%c10, %c0_68], %196 {strides = array<i32>} : memref<16x32xf32, #tpu.memory_space<vmem>>, vector<2x32xf32>,
    %cst_69 = arith.constant dense<0.000000e+00> : vector<2x32xf32>
    %198 = tpu.matmul %196, %19, %cst_69 {dimension_numbers = #tpu.dot_dimension_numbers<[1], [0], [0], [1], [0, 0, 1, 1], [], []>} : vector<2x32xf32>, vector<32x32xf32>, vector<2x32xf32> -> vector<2x32xf32>
    %cst_70 = arith.constant dense<0.000000e+00> : vector<2x32xf32>
    %199 = tpu.matmul %196, %20, %cst_70 {dimension_numbers = #tpu.dot_dimension_numbers<[1], [0], [0], [1], [0, 0, 1, 1], [], []>} : vector<2x32xf32>, vector<32x32xf32>, vector<2x32xf32> -> vector<2x32xf32>
    %cst_71 = arith.constant dense<0.000000e+00> : vector<2x32xf32>
    %200 = tpu.matmul %196, %21, %cst_71 {dimension_numbers = #tpu.dot_dimension_numbers<[1], [0], [0], [1], [0, 0, 1, 1], [], []>} : vector<2x32xf32>, vector<32x32xf32>, vector<2x32xf32> -> vector<2x32xf32>
    %201 = vector.broadcast %22 : vector<1x32xf32> to vector<2x32xf32>
    %202 = arith.addf %200, %201 : vector<2x32xf32>
    %203 = vector.extract_strided_slice %8 {offsets = [12, 0], sizes = [2, 32], strides = [1, 1]} : vector<16x32xf32> to vector<2x32xf32>
    %204 = arith.addf %203, %198 : vector<2x32xf32>
    %205 = arith.negf %204 : vector<2x32xf32>
    %206 = math.exp %205 : vector<2x32xf32>
    %cst_72 = arith.constant 1.000000e+00 : f32
    %207 = vector.broadcast %cst_72 : f32 to vector<2x32xf32>
    %208 = arith.addf %207, %206 : vector<2x32xf32>
    %209 = arith.divf %207, %208 : vector<2x32xf32>
    %210 = vector.extract_strided_slice %13 {offsets = [12, 0], sizes = [2, 32], strides = [1, 1]} : vector<16x32xf32> to vector<2x32xf32>
    %211 = arith.addf %210, %199 : vector<2x32xf32>
    %212 = arith.negf %211 : vector<2x32xf32>
    %213 = math.exp %212 : vector<2x32xf32>
    %cst_73 = arith.constant 1.000000e+00 : f32
    %214 = vector.broadcast %cst_73 : f32 to vector<2x32xf32>
    %215 = arith.addf %214, %213 : vector<2x32xf32>
    %216 = arith.divf %214, %215 : vector<2x32xf32>
    %217 = vector.extract_strided_slice %18 {offsets = [12, 0], sizes = [2, 32], strides = [1, 1]} : vector<16x32xf32> to vector<2x32xf32>
    %218 = arith.mulf %209, %202 : vector<2x32xf32>
    %219 = arith.addf %217, %218 : vector<2x32xf32>
    %220 = math.tanh %219 : vector<2x32xf32>
    %cst_74 = arith.constant 1.000000e+00 : f32
    %221 = vector.broadcast %cst_74 : f32 to vector<2x32xf32>
    %222 = arith.subf %221, %216 : vector<2x32xf32>
    %223 = arith.mulf %222, %220 : vector<2x32xf32>
    %224 = arith.mulf %216, %196 : vector<2x32xf32>
    %225 = arith.addf %223, %224 : vector<2x32xf32>
    %c12 = arith.constant 12 : index
    %c0_75 = arith.constant 0 : index
    %226 = vector.load %arg18[%c12, %c0_75] : memref<16x32xf32, #tpu.memory_space<vmem>>, vector<2x32xf32>
    tpu.vector_store %arg18[%c12, %c0_75], %225 {strides = array<i32>} : memref<16x32xf32, #tpu.memory_space<vmem>>, vector<2x32xf32>,
    %cst_76 = arith.constant dense<0.000000e+00> : vector<2x32xf32>
    %227 = tpu.matmul %225, %19, %cst_76 {dimension_numbers = #tpu.dot_dimension_numbers<[1], [0], [0], [1], [0, 0, 1, 1], [], []>} : vector<2x32xf32>, vector<32x32xf32>, vector<2x32xf32> -> vector<2x32xf32>
    %cst_77 = arith.constant dense<0.000000e+00> : vector<2x32xf32>
    %228 = tpu.matmul %225, %20, %cst_77 {dimension_numbers = #tpu.dot_dimension_numbers<[1], [0], [0], [1], [0, 0, 1, 1], [], []>} : vector<2x32xf32>, vector<32x32xf32>, vector<2x32xf32> -> vector<2x32xf32>
    %cst_78 = arith.constant dense<0.000000e+00> : vector<2x32xf32>
    %229 = tpu.matmul %225, %21, %cst_78 {dimension_numbers = #tpu.dot_dimension_numbers<[1], [0], [0], [1], [0, 0, 1, 1], [], []>} : vector<2x32xf32>, vector<32x32xf32>, vector<2x32xf32> -> vector<2x32xf32>
    %230 = vector.broadcast %22 : vector<1x32xf32> to vector<2x32xf32>
    %231 = arith.addf %229, %230 : vector<2x32xf32>
    %232 = vector.extract_strided_slice %8 {offsets = [14, 0], sizes = [2, 32], strides = [1, 1]} : vector<16x32xf32> to vector<2x32xf32>
    %233 = arith.addf %232, %227 : vector<2x32xf32>
    %234 = arith.negf %233 : vector<2x32xf32>
    %235 = math.exp %234 : vector<2x32xf32>
    %cst_79 = arith.constant 1.000000e+00 : f32
    %236 = vector.broadcast %cst_79 : f32 to vector<2x32xf32>
    %237 = arith.addf %236, %235 : vector<2x32xf32>
    %238 = arith.divf %236, %237 : vector<2x32xf32>
    %239 = vector.extract_strided_slice %13 {offsets = [14, 0], sizes = [2, 32], strides = [1, 1]} : vector<16x32xf32> to vector<2x32xf32>
    %240 = arith.addf %239, %228 : vector<2x32xf32>
    %241 = arith.negf %240 : vector<2x32xf32>
    %242 = math.exp %241 : vector<2x32xf32>
    %cst_80 = arith.constant 1.000000e+00 : f32
    %243 = vector.broadcast %cst_80 : f32 to vector<2x32xf32>
    %244 = arith.addf %243, %242 : vector<2x32xf32>
    %245 = arith.divf %243, %244 : vector<2x32xf32>
    %246 = vector.extract_strided_slice %18 {offsets = [14, 0], sizes = [2, 32], strides = [1, 1]} : vector<16x32xf32> to vector<2x32xf32>
    %247 = arith.mulf %238, %231 : vector<2x32xf32>
    %248 = arith.addf %246, %247 : vector<2x32xf32>
    %249 = math.tanh %248 : vector<2x32xf32>
    %cst_81 = arith.constant 1.000000e+00 : f32
    %250 = vector.broadcast %cst_81 : f32 to vector<2x32xf32>
    %251 = arith.subf %250, %245 : vector<2x32xf32>
    %252 = arith.mulf %251, %249 : vector<2x32xf32>
    %253 = arith.mulf %245, %225 : vector<2x32xf32>
    %254 = arith.addf %252, %253 : vector<2x32xf32>
    %c14 = arith.constant 14 : index
    %c0_82 = arith.constant 0 : index
    %255 = vector.load %arg18[%c14, %c0_82] : memref<16x32xf32, #tpu.memory_space<vmem>>, vector<2x32xf32>
    tpu.vector_store %arg18[%c14, %c0_82], %254 {strides = array<i32>} : memref<16x32xf32, #tpu.memory_space<vmem>>, vector<2x32xf32>,
    %c0_83 = arith.constant 0 : index
    %c0_84 = arith.constant 0 : index
    %256 = vector.load %arg17[%c0_83, %c0_84] : memref<2x32xf32, #tpu.memory_space<vmem>>, vector<2x32xf32>
    tpu.vector_store %arg17[%c0_83, %c0_84], %254 {strides = array<i32>} : memref<2x32xf32, #tpu.memory_space<vmem>>, vector<2x32xf32>,
    %c0_85 = arith.constant 0 : index
    %c0_86 = arith.constant 0 : index
    %257 = vector.load %arg18[%c0_85, %c0_86] : memref<16x32xf32, #tpu.memory_space<vmem>>, vector<16x32xf32>
    %c0_87 = arith.constant 0 : index
    %c0_88 = arith.constant 0 : index
    %258 = vector.load %arg12[%c0_87, %c0_88] : memref<32x32xf32, #tpu.memory_space<vmem>>, vector<32x32xf32>
    %cst_89 = arith.constant dense<0.000000e+00> : vector<16x32xf32>
    %259 = tpu.matmul %257, %258, %cst_89 {dimension_numbers = #tpu.dot_dimension_numbers<[1], [0], [0], [1], [0, 0, 1, 1], [], []>} : vector<16x32xf32>, vector<32x32xf32>, vector<16x32xf32> -> vector<16x32xf32>
    %cst_90 = arith.constant 0.000000e+00 : f32
    %260 = vector.broadcast %cst_90 : f32 to vector<16x32xf32>
    %261 = arith.cmpf ogt, %259, %260 : vector<16x32xf32>
    %cst_91 = arith.constant 0.00999999977 : f32
    %262 = vector.broadcast %cst_91 : f32 to vector<16x32xf32>
    %263 = arith.mulf %262, %259 : vector<16x32xf32>
    %264 = arith.select %261, %259, %263 : vector<16x32xi1>, vector<16x32xf32>
    %c0_92 = arith.constant 0 : index
    %c0_93 = arith.constant 0 : index
    %265 = vector.load %arg13[%c0_92, %c0_93] : memref<32x32xf32, #tpu.memory_space<vmem>>, vector<32x32xf32>
    %cst_94 = arith.constant dense<0.000000e+00> : vector<16x32xf32>
    %266 = tpu.matmul %264, %265, %cst_94 {dimension_numbers = #tpu.dot_dimension_numbers<[1], [0], [0], [1], [0, 0, 1, 1], [], []>} : vector<16x32xf32>, vector<32x32xf32>, vector<16x32xf32> -> vector<16x32xf32>
    %cst_95 = arith.constant 0.000000e+00 : f32
    %267 = vector.broadcast %cst_95 : f32 to vector<16x32xf32>
    %268 = arith.cmpf ogt, %266, %267 : vector<16x32xf32>
    %cst_96 = arith.constant 0.00999999977 : f32
    %269 = vector.broadcast %cst_96 : f32 to vector<16x32xf32>
    %270 = arith.mulf %269, %266 : vector<16x32xf32>
    %271 = arith.select %268, %266, %270 : vector<16x32xi1>, vector<16x32xf32>
    %c0_97 = arith.constant 0 : index
    %c0_98 = arith.constant 0 : index
    %272 = vector.load %arg14[%c0_97, %c0_98] : memref<32x1xf32, #tpu.memory_space<vmem>>, vector<32x1xf32>
    %cst_99 = arith.constant dense<0.000000e+00> : vector<16x1xf32>
    %273 = tpu.matmul %271, %272, %cst_99 {dimension_numbers = #tpu.dot_dimension_numbers<[1], [0], [0], [1], [0, 0, 1, 1], [], []>} : vector<16x32xf32>, vector<32x1xf32>, vector<16x1xf32> -> vector<16x1xf32>
    %c0_100 = arith.constant 0 : index
    %c0_101 = arith.constant 0 : index
    %274 = vector.load %arg15[%c0_100, %c0_101] : memref<1x1xf32, #tpu.memory_space<vmem>>, vector<1x1xf32>
    %275 = vector.broadcast %274 : vector<1x1xf32> to vector<16x1xf32>
    %276 = arith.addf %273, %275 : vector<16x1xf32>
    %cst_102 = arith.constant 0.000000e+00 : f32
    %277 = vector.broadcast %cst_102 : f32 to vector<16x1xf32>
    %278 = arith.cmpf ogt, %276, %277 : vector<16x1xf32>
    %cst_103 = arith.constant 0.00999999977 : f32
    %279 = vector.broadcast %cst_103 : f32 to vector<16x1xf32>
    %280 = arith.mulf %279, %276 : vector<16x1xf32>
    %281 = arith.select %278, %276, %280 : vector<16x1xi1>, vector<16x1xf32>
    %c0_104 = arith.constant 0 : index
    %c0_105 = arith.constant 0 : index
    %282 = vector.load %arg16[%c0_104, %c0_105] : memref<16x1xf32, #tpu.memory_space<vmem>>, vector<16x1xf32>
    tpu.vector_store %arg16[%c0_104, %c0_105], %281 {strides = array<i32>} : memref<16x1xf32, #tpu.memory_space<vmem>>, vector<16x1xf32>,
    return
  }
  func.func @transform_0(%arg0: i32) -> (i32, i32) {
    %c0_i32 = arith.constant 0 : i32
    %c0_i32_0 = arith.constant 0 : i32
    return %arg0, %c0_i32 : i32, i32
  }
  func.func @transform_1(%arg0: i32) -> (i32, i32) {
    %c0_i32 = arith.constant 0 : i32
    %c0_i32_0 = arith.constant 0 : i32
    %c0_i32_1 = arith.constant 0 : i32
    return %c0_i32, %c0_i32_0 : i32, i32
  }
  func.func @transform_2(%arg0: i32) -> (i32, i32) {
    %c0_i32 = arith.constant 0 : i32
    %c0_i32_0 = arith.constant 0 : i32
    %c0_i32_1 = arith.constant 0 : i32
    return %c0_i32, %c0_i32_0 : i32, i32
  }
  func.func @transform_3(%arg0: i32) -> (i32, i32) {
    %c0_i32 = arith.constant 0 : i32
    %c0_i32_0 = arith.constant 0 : i32
    %c0_i32_1 = arith.constant 0 : i32
    return %c0_i32, %c0_i32_0 : i32, i32
  }
  func.func @transform_4(%arg0: i32) -> (i32, i32) {
    %c0_i32 = arith.constant 0 : i32
    %c0_i32_0 = arith.constant 0 : i32
    %c0_i32_1 = arith.constant 0 : i32
    return %c0_i32, %c0_i32_0 : i32, i32
  }
  func.func @transform_5(%arg0: i32) -> (i32, i32) {
    %c0_i32 = arith.constant 0 : i32
    %c0_i32_0 = arith.constant 0 : i32
    %c0_i32_1 = arith.constant 0 : i32
    return %c0_i32, %c0_i32_0 : i32, i32
  }
  func.func @transform_6(%arg0: i32) -> (i32, i32) {
    %c0_i32 = arith.constant 0 : i32
    %c0_i32_0 = arith.constant 0 : i32
    %c0_i32_1 = arith.constant 0 : i32
    return %c0_i32, %c0_i32_0 : i32, i32
  }
  func.func @transform_7(%arg0: i32) -> (i32, i32) {
    %c0_i32 = arith.constant 0 : i32
    %c0_i32_0 = arith.constant 0 : i32
    %c0_i32_1 = arith.constant 0 : i32
    return %c0_i32, %c0_i32_0 : i32, i32
  }
  func.func @transform_8(%arg0: i32) -> (i32, i32) {
    %c0_i32 = arith.constant 0 : i32
    %c0_i32_0 = arith.constant 0 : i32
    %c0_i32_1 = arith.constant 0 : i32
    return %c0_i32, %c0_i32_0 : i32, i32
  }
  func.func @transform_9(%arg0: i32) -> (i32, i32) {
    %c0_i32 = arith.constant 0 : i32
    %c0_i32_0 = arith.constant 0 : i32
    %c0_i32_1 = arith.constant 0 : i32
    return %c0_i32, %c0_i32_0 : i32, i32
  }
  func.func @transform_10(%arg0: i32) -> (i32, i32) {
    %c0_i32 = arith.constant 0 : i32
    %c0_i32_0 = arith.constant 0 : i32
    %c0_i32_1 = arith.constant 0 : i32
    return %c0_i32, %c0_i32_0 : i32, i32
  }
  func.func @transform_11(%arg0: i32) -> (i32, i32) {
    %c0_i32 = arith.constant 0 : i32
    %c0_i32_0 = arith.constant 0 : i32
    %c0_i32_1 = arith.constant 0 : i32
    return %c0_i32, %c0_i32_0 : i32, i32
  }
  func.func @transform_12(%arg0: i32) -> (i32, i32) {
    %c0_i32 = arith.constant 0 : i32
    %c0_i32_0 = arith.constant 0 : i32
    %c0_i32_1 = arith.constant 0 : i32
    return %c0_i32, %c0_i32_0 : i32, i32
  }
  func.func @transform_13(%arg0: i32) -> (i32, i32) {
    %c0_i32 = arith.constant 0 : i32
    %c0_i32_0 = arith.constant 0 : i32
    %c0_i32_1 = arith.constant 0 : i32
    return %c0_i32, %c0_i32_0 : i32, i32
  }
  func.func @transform_14(%arg0: i32) -> (i32, i32) {
    %c0_i32 = arith.constant 0 : i32
    %c0_i32_0 = arith.constant 0 : i32
    %c0_i32_1 = arith.constant 0 : i32
    return %c0_i32, %c0_i32_0 : i32, i32
  }
  func.func @transform_15(%arg0: i32) -> (i32, i32) {
    %c0_i32 = arith.constant 0 : i32
    %c0_i32_0 = arith.constant 0 : i32
    return %arg0, %c0_i32 : i32, i32
  }
}

</mosaic_0001>

<bundles_post_ra>
// kernel: tpu_custom_call.1
= control target key start
LH: loop header
LB: loop body
LE: loop exit
PB: predicated region body
PF: predicated region fallthrough
CT: control target
= control target key end

     0   :  { %vm56_vm0 = vcmask 254976   ;;  %v3554_v7 = vmov 0.0   ;;  %vm79_vm1 = vcmask 785408   ;;  %v3555_v47 = vmov 0.0|0.0   ;;  %s4109_s2 = inlined_call_operand.vmem [shape: f32[96,32], index: 2, kind: input, shape index: {}]   ;;  %s4110_s1 = inlined_call_operand.vmem [shape: f32[96,32], index: 1, kind: input, shape index: {}]   ;;  %s4111_s0 = inlined_call_operand.vmem [shape: f32[16,96], index: 0, kind: input, shape index: {}]   ;;  %s4112_s3 = inlined_call_operand.vmem [shape: f32[96,32], index: 3, kind: input, shape index: {}]   ;;  %s4113_s4 = inlined_call_operand.vmem [shape: f32[32,32], index: 4, kind: input, shape index: {}]   ;;  %s4114_s5 = inlined_call_operand.vmem [shape: f32[32,32], index: 5, kind: input, shape index: {}]   ;;  %s4115_s6 = inlined_call_operand.vmem [shape: f32[32,32], index: 6, kind: input, shape index: {}]   ;;  %s4116_s8 = inlined_call_operand.vmem [shape: f32[1,32], index: 8, kind: input, shape index: {}]   ;;  %s4117_s7 = inlined_call_operand.vmem [shape: f32[1,32], index: 7, kind: input, shape index: {}]   ;;  %s4118_s9 = inlined_call_operand.vmem [shape: f32[1,32], index: 9, kind: input, shape index: {}]   ;;  %s4119_s10 = inlined_call_operand.vmem [shape: f32[1,32], index: 10, kind: input, shape index: {}]   ;;  %s4120_s11 = inlined_call_operand.vmem [shape: f32[32,32], index: 11, kind: input, shape index: {}]   ;;  %s4121_s12 = inlined_call_operand.vmem [shape: f32[32,32], index: 12, kind: input, shape index: {}]   ;;  %s4122_s13 = inlined_call_operand.vmem [shape: f32[32,1], index: 13, kind: input, shape index: {}]   ;;  %s4123_s14 = inlined_call_operand.<no memory space> [shape: f32[1,1], index: 14, kind: input, shape index: {}]   ;;  %s4124_s15 = inlined_call_operand.vmem [shape: f32[16,1], index: 15, kind: output, shape index: {}]  }
   0x1   :  { %v161_v0 = vld [vmem:[%s4109_s2] sm:$0xff]  ;;  %v162_v1 = vld [vmem:[%s4109_s2 + $0x8] sm:$0xff]  ;;  %v163_v5 = vld [vmem:[%s4109_s2 + $0x10] sm:$0xff]  ;;  %57 = vst.msk [vmem:[#allocation2] sm:$0x3] %vm56_vm0, %v3554_v7  ;;  %vm3556_vm2 = vmmov 0  }
   0x2   :  { %v60_v2 = vld [vmem:[%s4110_s1] sm:$0xff]  ;;  %v3255_v3 = vpack.c.bf16 %v162_v1, %v161_v0  ;;  %v61_v4 = vld [vmem:[%s4110_s1 + $0x8] sm:$0xff]  ;;  %v164_v6 = vld [vmem:[%s4109_s2 + $0x18] sm:$0xff]  ;;  %vm363_vm3 = vcmask 261120   ;;  %vm851_vm4 = vcmask 257026   ;;  %vm1099_vm5 = vcmask 259076  }
   0x3   :  { %v3231_v8 = vpack.c.bf16 %v61_v4, %v60_v2  ;;  %v3259_v9 = vpack.c.bf16 %v164_v6, %v163_v5  ;;  %v62_v10 = vld [vmem:[%s4110_s1 + $0x10] sm:$0xff]  ;;  %v63_v11 = vld [vmem:[%s4110_s1 + $0x18] sm:$0xff]  ;;  %v165_v12 = vld [vmem:[%s4109_s2 + $0x20] sm:$0xff]  ;;  %vm1347_vm6 = vcmask 261126   ;;  %vm2609_vm12 = vcmask 7168  }
   0x4   :  { %3256 = vmatprep.subr.bf16.mxu1 %v3255_v3  ;;  %v3235_v13 = vpack.c.bf16 %v63_v11, %v62_v10  ;;  %v166_v14 = vld [vmem:[%s4109_s2 + $0x28] sm:$0xff]  ;;  %v64_v15 = vld [vmem:[%s4110_s1 + $0x20] sm:$0xff]  ;;  %v167_v19 = vld [vmem:[%s4109_s2 + $0x30] sm:$0xff] }
   0x5   :  { %v65_v16 = vld [vmem:[%s4110_s1 + $0x28] sm:$0xff]  ;;  %3258 = vmatpush3.bf16.msra.mxu1 %v3255_v3  ;;  %3232 = vmatprep.subr.bf16.mxu0 %v3231_v8  ;;  %v3263_v17 = vpack.c.bf16 %v166_v14, %v165_v12  ;;  %v168_v20 = vld [vmem:[%s4109_s2 + $0x38] sm:$0xff]  ;;  %v66_v21 = vld [vmem:[%s4110_s1 + $0x30] sm:$0xff] }
   0x6   :  { %3260 = vmatprep.subr.bf16.mxu1 %v3259_v9  ;;  %3234 = vmatpush3.bf16.msra.mxu0 %v3231_v8  ;;  %v3239_v18 = vpack.c.bf16 %v65_v16, %v64_v15  ;;  %v67_v22 = vld [vmem:[%s4110_s1 + $0x38] sm:$0xff]  ;;  %v3690_v23 = vld [vmem:[%s4111_s0] sm:$0xff]  ;;  %v3267_v24 = vpack.c.bf16 %v168_v20, %v167_v19  ;;  %v170_v27 = vld [vmem:[%s4109_s2 + $0x48] sm:$0xff] }
   0x7   :  { %3236 = vmatprep.subr.bf16.mxu0 %v3235_v13  ;;  %2904 = vmatprep.mubr.msk.f32.mxu1 %vm79_vm1, %v3690_v23  ;;  %v3243_v25 = vpack.c.bf16 %v67_v22, %v66_v21  ;;  %v169_v26 = vld [vmem:[%s4109_s2 + $0x40] sm:$0xff]  ;;  %v69_v29 = vld [vmem:[%s4110_s1 + $0x48] sm:$0xff]  ;;  %v171_v32 = vld [vmem:[%s4109_s2 + $0x50] sm:$0xff] }
   0x8   :  { %2877 = vmatprep.mubr.msk.f32.mxu0 %vm79_vm1, %v3690_v23  ;;  %v68_v28 = vld [vmem:[%s4110_s1 + $0x40] sm:$0xff]  ;;  %v3271_v30 = vpack.c.bf16 %v170_v27, %v169_v26  ;;  %v172_v33 = vld [vmem:[%s4109_s2 + $0x58] sm:$0xff]  ;;  %v70_v34 = vld [vmem:[%s4110_s1 + $0x50] sm:$0xff] }
   0x9   :  { %3262 = vmatpush3.bf16.msra.mxu1 %v3259_v9  ;;  %v3247_v31 = vpack.c.bf16 %v69_v29, %v68_v28  ;;  %v71_v35 = vld [vmem:[%s4110_s1 + $0x58] sm:$0xff]  ;;  %v3275_v36 = vpack.c.bf16 %v172_v33, %v171_v32  ;;  %v255_v38 = vld [vmem:[%s4112_s3] sm:$0xff]  ;;  %v256_v39 = vld [vmem:[%s4112_s3 + $0x8] sm:$0xff] }
   0xa   :  { %3264 = vmatprep.subr.bf16.mxu1 %v3263_v17  ;;  %3238 = vmatpush3.bf16.msra.mxu0 %v3235_v13  ;;  %v3251_v37 = vpack.c.bf16 %v71_v35, %v70_v34  ;;  %v349_v40 = vld [vmem:[%s4113_s4] sm:$0xff]  ;;  %v350_v41 = vld [vmem:[%s4113_s4 + $0x8] sm:$0xff]  ;;  %v3279_v42 = vpack.c.bf16 %v256_v39, %v255_v38  ;;  %v257_v45 = vld [vmem:[%s4112_s3 + $0x10] sm:$0xff] }
   0xb   :  { %3240 = vmatprep.subr.bf16.mxu0 %v3239_v18  ;;  %v3735_v43 = vld [vmem:[%s4111_s0 + $0x8] sm:$0xff]  ;;  %v3737_v44 = vpack.c.bf16 %v350_v41, %v349_v40  ;;  %v258_v46 = vld [vmem:[%s4112_s3 + $0x18] sm:$0xff]  ;;  %v351_v48 = vld [vmem:[%s4113_s4 + $0x10] sm:$0xff] }
   0xc   :  { %v352_v49 = vld [vmem:[%s4113_s4 + $0x18] sm:$0xff]  ;;  %v3283_v50 = vpack.c.bf16 %v258_v46, %v257_v45  ;;  %v259_v52 = vld [vmem:[%s4112_s3 + $0x20] sm:$0xff]  ;;  %v260_v53 = vld [vmem:[%s4112_s3 + $0x28] sm:$0xff] }
   0xd   :  { %3266 = vmatpush3.bf16.msra.mxu1 %v3263_v17  ;;  %v3757_v51 = vpack.c.bf16 %v352_v49, %v351_v48  ;;  %v353_v54 = vld [vmem:[%s4114_s5] sm:$0xff]  ;;  %v354_v55 = vld [vmem:[%s4114_s5 + $0x8] sm:$0xff]  ;;  %v3287_v56 = vpack.c.bf16 %v260_v53, %v259_v52  ;;  %v261_v59 = vld [vmem:[%s4112_s3 + $0x30] sm:$0xff] }
   0xe   :  { %3268 = vmatprep.subr.bf16.mxu1 %v3267_v24  ;;  %3242 = vmatpush3.bf16.msra.mxu0 %v3239_v18  ;;  %v3777_v57 = vld [vmem:[#allocation2] sm:$0x3]  ;;  %v3779_v58 = vpack.c.bf16 %v354_v55, %v353_v54  ;;  %v262_v60 = vld [vmem:[%s4112_s3 + $0x38] sm:$0xff]  ;;  %v355_v61 = vld [vmem:[%s4114_s5 + $0x10] sm:$0xff] }
   0xf   :  { %3244 = vmatprep.subr.bf16.mxu0 %v3243_v25  ;;  %v356_v62 = vld [vmem:[%s4114_s5 + $0x18] sm:$0xff]  ;;  %v3291_v63 = vpack.c.bf16 %v262_v60, %v261_v59  ;;  %v263_v1 = vld [vmem:[%s4112_s3 + $0x40] sm:$0xff]  ;;  %v264_v2 = vld [vmem:[%s4112_s3 + $0x48] sm:$0xff] }
  0x10   :  { %v3797_v0 = vpack.c.bf16 %v356_v62, %v355_v61  ;;  %v357_v3 = vld [vmem:[%s4115_s6] sm:$0xff]  ;;  %v358_v4 = vld [vmem:[%s4115_s6 + $0x8] sm:$0xff]  ;;  %v3295_v5 = vpack.c.bf16 %v264_v2, %v263_v1  ;;  %v265_v8 = vld [vmem:[%s4112_s3 + $0x50] sm:$0xff] }
  0x11   :  { %3270 = vmatpush3.bf16.msra.mxu1 %v3267_v24  ;;  %v3815_v6 = vpack.c.bf16 %v358_v4, %v357_v3  ;;  %v266_v9 = vld [vmem:[%s4112_s3 + $0x58] sm:$0xff]  ;;  %v359_v10 = vld [vmem:[%s4115_s6 + $0x10] sm:$0xff]  ;;  %v2619_v14 = vld [vmem:[%s4116_s8] ss:$0 sm:$0xff] }
  0x12   :  { %3272 = vmatprep.subr.bf16.mxu1 %v3271_v30  ;;  %3246 = vmatpush3.bf16.msra.mxu0 %v3243_v25  ;;  %v360_v11 = vld [vmem:[%s4115_s6 + $0x18] sm:$0xff]  ;;  %v3299_v12 = vpack.c.bf16 %v266_v9, %v265_v8  ;;  %v2616_v15 = vld [vmem:[%s4117_s7] ss:$0 sm:$0xff] }
  0x13   :  { %3248 = vmatprep.subr.bf16.mxu0 %v3247_v31  ;;  %v3833_v13 = vpack.c.bf16 %v360_v11, %v359_v10  ;;  %v2622_v35 = vld [vmem:[%s4118_s9] ss:$0 sm:$0xff] }
  0x14   :  { %v3881_v40 = vld [vmem:[%s4119_s10] ss:$0 sm:$0xff] }
  0x15   :  { %3274 = vmatpush3.bf16.msra.mxu1 %v3271_v30 }
  0x16   :  { %3276 = vmatprep.subr.bf16.mxu1 %v3275_v36  ;;  %3250 = vmatpush3.bf16.msra.mxu0 %v3247_v31 }
  0x17   :  { %3252 = vmatprep.subr.bf16.mxu0 %v3251_v37 }
  0x19   :  { %3278 = vmatpush3.bf16.msra.mxu1 %v3275_v36 }
  0x1a   :  { %3303 = vmatprep.subr.bf16.mxu1 %v3555_v47  ;;  %3254 = vmatpush3.bf16.msra.mxu0 %v3251_v37 }
  0x1b   :  { %3280 = vmatprep.subr.bf16.mxu0 %v3279_v42 }
  0x1c   :  { %2905 = vmatmul.mubr.msk.f32.vlgmr.msra.gmra.mrb[0].mxu1 %vm79_vm1, %v3735_v43 }
  0x1d   :  { %3305 = vmatpush3.bf16.msra.mxu1 %v3737_v44  ;;  %2878 = vmatmul.mubr.msk.f32.vlgmr.msra.gmra.mrb[0].mxu0 %vm79_vm1, %v3735_v43 }
  0x1e   :  { %3306 = vmatprep.subr.bf16.mxu1 %v3555_v47  ;;  %2942 = vmatprep.mubr.msk.f32.mxu1 %vm3556_vm2, %v3554_v7 }
  0x1f   :  { %3282 = vmatpush3.bf16.msra.mxu0 %v3279_v42  ;;  %2931 = vmatprep.mubr.msk.f32.mxu0 %vm79_vm1, %v3690_v23 }
  0x20   :  { %3284 = vmatprep.subr.bf16.mxu0 %v3283_v50 }
  0x21   :  { %3308 = vmatpush3.bf16.msra.mxu1 %v3757_v51 }
  0x22   :  { %3309 = vmatprep.subr.bf16.mxu1 %v3555_v47 }
  0x23   :  { %3286 = vmatpush3.bf16.msra.mxu0 %v3283_v50 }
  0x24   :  { %2943 = vmatmul.mubr.msk.f32.vlgmr.msra.gmra.mrb[2].mxu1 %vm363_vm3, %v3777_v57  ;;  %3288 = vmatprep.subr.bf16.mxu0 %v3287_v56 }
  0x25   :  { %3311 = vmatpush3.bf16.msra.mxu1 %v3779_v58  ;;  %2953 = vmatprep.mubr.msk.f32.mxu1 %vm3556_vm2, %v3554_v7 }
  0x26   :  { %3312 = vmatprep.subr.bf16.mxu1 %v3555_v47 }
  0x27   :  { %3290 = vmatpush3.bf16.msra.mxu0 %v3287_v56 }
  0x28   :  { %3292 = vmatprep.subr.bf16.mxu0 %v3291_v63 }
  0x29   :  { %3314 = vmatpush3.bf16.msra.mxu1 %v3797_v0 }
  0x2a   :  { %3315 = vmatprep.subr.bf16.mxu1 %v3555_v47 }
  0x2b   :  { %3294 = vmatpush3.bf16.msra.mxu0 %v3291_v63 }
  0x2c   :  { %2954 = vmatmul.mubr.msk.f32.vlgmr.msra.gmra.mrb[4].mxu1 %vm363_vm3, %v3777_v57  ;;  %3296 = vmatprep.subr.bf16.mxu0 %v3295_v5 }
  0x2d   :  { %3317 = vmatpush3.bf16.msra.mxu1 %v3815_v6  ;;  %2964 = vmatprep.mubr.msk.f32.mxu1 %vm3556_vm2, %v3554_v7 }
  0x2e   :  { %3318 = vmatprep.subr.bf16.mxu1 %v3555_v47 }
  0x2f   :  { %3298 = vmatpush3.bf16.msra.mxu0 %v3295_v5 }
  0x30   :  { %3300 = vmatprep.subr.bf16.mxu0 %v3299_v12 }
  0x31   :  { %3320 = vmatpush3.bf16.msra.mxu1 %v3833_v13 }
  0x32   :  { %3327 = vmatprep.subr.bf16.mxu1 %v3555_v47 }
  0x33   :  { %3302 = vmatpush3.bf16.msra.mxu0 %v3299_v12 }
  0x34   :  { %2965 = vmatmul.mubr.msk.f32.vlgmr.msra.gmra.mrb[6].mxu1 %vm363_vm3, %v3777_v57  ;;  %3321 = vmatprep.subr.bf16.mxu0 %v3555_v47 }
  0x35   :  { %3329 = vmatpush3.bf16.msra.mxu1 %v3779_v58  ;;  %2986 = vmatprep.mubr.msk.f32.mxu1 %vm3556_vm2, %v3554_v7 }
  0x36   :  { %2932 = vmatmul.mubr.msk.f32.vlgmr.msra.gmra.mrb[2].mxu0 %vm79_vm1, %v3735_v43  ;;  %3330 = vmatprep.subr.bf16.mxu1 %v3555_v47 }
  0x37   :  { %3323 = vmatpush3.bf16.msra.mxu0 %v3737_v44  ;;  %2975 = vmatprep.mubr.msk.f32.mxu0 %vm3556_vm2, %v3554_v7 }
  0x38   :  { %3324 = vmatprep.subr.bf16.mxu0 %v3555_v47 }
  0x39   :  { %3332 = vmatpush3.bf16.msra.mxu1 %v3797_v0 }
  0x3a   :  { %3339 = vmatprep.subr.bf16.mxu1 %v3555_v47 }
  0x3b   :  { %3326 = vmatpush3.bf16.msra.mxu0 %v3757_v51 }
  0x3c   :  { %3333 = vmatprep.subr.bf16.mxu0 %v3555_v47 }
  0xef   :  { %v2906_v16 = vpop.f32.mrb[0].mxu1 }
  0xf0   :  { %v3863_v17 = vadd.f32 %v2906_v16, %v2619_v14  ;;  %v246_v18 = vpop.f32.mrb[1].mxu1  ;;  %v2879_v19 = vpop.f32.mrb[0].mxu0 }
  0xf1   :  { %v3865_v20 = vadd.f32 %v2879_v19, %v2616_v15  ;;  %v152_v21 = vpop.f32.mrb[1].mxu0  ;;  %v3870_v27 = vadd.f32 %v2619_v14, %v246_v18 }
  0xf2   :  { %v3867_v22 = vadd.f32 %v2616_v15, %v152_v21 }
  0xf7   :  { %v433_v23 = vpop.f32.mrb[2].mxu1 }
  0xf8   :  { %v583_v24 = vadd.f32 %v433_v23, %v3867_v22  ;;  %v2944_v25 = vpop.f32.mrb[3].mxu1 }
  0xfa   :  { %v2629_v26 = vmul.f32 -1.442695, %v583_v24 }
  0xfc   :  { %3474 = vpow2.f32 %v2629_v26 }
  0xff   :  { %v503_v28 = vpop.f32.mrb[4].mxu1 }
 0x100   :  { %v590_v29 = vadd.f32 %v503_v28, %v3870_v27  ;;  %v2955_v30 = vpop.f32.mrb[5].mxu1 }
 0x102   :  { %v2630_v31 = vmul.f32 -1.442695, %v590_v29 }
 0x104   :  { %3476 = vpow2.f32 %v2630_v31 }
 0x106   :  { %v3475_v32 = vpop.eup %3474 }
 0x107   :  { %v587_v33 = vadd.f32 1.0, %v3475_v32  ;;  %v579_v34 = vpop.f32.mrb[6].mxu1 }
 0x108   :  { %v2966_v36 = vpop.f32.mrb[7].mxu1  ;;  %v580_v43 = vadd.f32 %v3881_v40, %v579_v34 }
 0x109   :  { %3478 = vrcp.f32 %v587_v33  ;;  %v2933_v37 = vpop.f32.mrb[2].mxu0 }
 0x10a   :  { %v3876_v38 = vadd.f32 %v2933_v37, %v2622_v35  ;;  %v340_v39 = vpop.f32.mrb[3].mxu0 }
 0x10b   :  { %v3884_v45 = vadd.f32 %v2622_v35, %v340_v39 }
 0x10e   :  { %v3477_v41 = vpop.eup %3476 }
 0x10f   :  { %v594_v42 = vadd.f32 1.0, %v3477_v41 }
 0x111   :  { %3480 = vrcp.f32 %v594_v42 }
 0x113   :  { %v3479_v46 = vpop.eup %3478 }
 0x114   :  { %v597_v48 = vmul.f32 %v3479_v46, %v580_v43 }
 0x116   :  { %v598_v49 = vadd.f32 %v597_v48, %v3884_v45 }
 0x118   :  { %3482 = vtanh.f32 %v598_v49 }
 0x11b   :  { %v3481_v50 = vpop.eup %3480 }
 0x11c   :  { %v600_v52 = vsub.f32 1.0, %v3481_v50  ;;  %v602_v55 = vmul.f32 %v3481_v50, %v3777_v57 }
 0x122   :  { %v3483_v53 = vpop.eup %3482 }
 0x123   :  { %v601_v54 = vmul.f32 %v3483_v53, %v600_v52 }
 0x125   :  { %v603_v56 = vadd.f32 %v602_v55, %v601_v54 }
 0x127   :  { %605 = vst.msk [vmem:[#allocation3] sm:$0x3] %vm56_vm0, %v603_v56  ;;  %2976 = vmatmul.mubr.msk.f32.vlgmr.msra.gmra.mrb[4].mxu0 %vm363_vm3, %v603_v56  ;;  %2987 = vmatmul.mubr.msk.f32.vlgmr.msra.gmra.mrb[8].mxu1 %vm363_vm3, %v603_v56  ;;  %v847_v18 = vrot.slane %v603_v56, 6 }
 0x128   :  { %3335 = vmatpush3.bf16.msra.mxu0 %v3815_v6  ;;  %2997 = vmatprep.mubr.msk.f32.mxu0 %vm3556_vm2, %v3554_v7 }
 0x129   :  { %3336 = vmatprep.subr.bf16.mxu0 %v3555_v47  ;;  %3341 = vmatpush3.bf16.msra.mxu1 %v3737_v44 }
 0x12a   :  { %3342 = vmatprep.subr.bf16.mxu1 %v3555_v47  ;;  %3008 = vmatprep.mubr.msk.f32.mxu1 %vm3556_vm2, %v3554_v7 }
 0x12c   :  { %3338 = vmatpush3.bf16.msra.mxu0 %v3833_v13 }
 0x12d   :  { %3345 = vmatprep.subr.bf16.mxu0 %v3555_v47  ;;  %3344 = vmatpush3.bf16.msra.mxu1 %v3757_v51 }
 0x12e   :  { %3351 = vmatprep.subr.bf16.mxu1 %v3555_v47 }
 0x12f   :  { %2998 = vmatmul.mubr.msk.f32.vlgmr.msra.gmra.mrb[6].mxu0 %vm363_vm3, %v603_v56 }
 0x130   :  { %3347 = vmatpush3.bf16.msra.mxu0 %v3779_v58  ;;  %3019 = vmatprep.mubr.msk.f32.mxu0 %vm3556_vm2, %v3554_v7 }
 0x131   :  { %3348 = vmatprep.subr.bf16.mxu0 %v3555_v47 }
 0x134   :  { %3350 = vmatpush3.bf16.msra.mxu0 %v3797_v0 }
 0x135   :  { %3357 = vmatprep.subr.bf16.mxu0 %v3555_v47 }
 0x1fa   :  { %v675_v57 = vpop.f32.mrb[4].mxu0  ;;  %v745_v59 = vpop.f32.mrb[8].mxu1 }
 0x1fb   :  { %v820_v60 = vrot.slane %v675_v57, 6  ;;  %v830_v61 = vrot.slane %v745_v59, 6  ;;  %v2977_v62 = vpop.f32.mrb[5].mxu0  ;;  %v2988_v63 = vpop.f32.mrb[9].mxu1 }
 0x1fd   :  { %v822_v1 = vadd.f32 %v820_v60, %v3867_v22  ;;  %v832_v2 = vadd.f32 %v830_v61, %v3870_v27 }
 0x1ff   :  { %v2634_v3 = vmul.f32 -1.442695, %v822_v1  ;;  %v2635_v4 = vmul.f32 -1.442695, %v832_v2 }
 0x201   :  { %3484 = vpow2.f32 %v2634_v3 }
 0x202   :  { %3486 = vpow2.f32 %v2635_v4  ;;  %v815_v5 = vpop.f32.mrb[6].mxu0 }
 0x203   :  { %v2999_v8 = vpop.f32.mrb[7].mxu0  ;;  %v816_v14 = vadd.f32 %v3881_v40, %v815_v5 }
 0x205   :  { %v840_v15 = vrot.slane %v816_v14, 6 }
 0x20b   :  { %v3485_v9 = vpop.eup %3484 }
 0x20c   :  { %v3487_v10 = vpop.eup %3486  ;;  %v826_v11 = vadd.f32 1.0, %v3485_v9 }
 0x20d   :  { %v836_v12 = vadd.f32 1.0, %v3487_v10 }
 0x20e   :  { %3488 = vrcp.f32 %v826_v11 }
 0x20f   :  { %3490 = vrcp.f32 %v836_v12 }
 0x218   :  { %v3489_v16 = vpop.eup %3488 }
 0x219   :  { %v3491_v19 = vpop.eup %3490  ;;  %v842_v21 = vmul.f32 %v3489_v16, %v840_v15 }
 0x21a   :  { %v849_v23 = vmul.f32 %v3491_v19, %v847_v18  ;;  %v845_v25 = vsub.f32 1.0, %v3491_v19 }
 0x21b   :  { %v843_v24 = vadd.f32 %v842_v21, %v3884_v45 }
 0x21d   :  { %3492 = vtanh.f32 %v843_v24 }
 0x227   :  { %v3493_v26 = vpop.eup %3492 }
 0x228   :  { %v846_v28 = vmul.f32 %v3493_v26, %v845_v25 }
 0x22a   :  { %v850_v29 = vadd.f32 %v849_v23, %v846_v28 }
 0x22c   :  { %852 = vst.msk [vmem:[#allocation3] sm:$0xc] %vm851_vm4, %v850_v29  ;;  %v854_v30 = vrot.slane %v850_v29, 2  ;;  %v1095_v56 = vrot.slane %v850_v29, 6 }
 0x22e   :  { %3009 = vmatmul.mubr.msk.f32.vlgmr.msra.gmra.mrb[10].mxu1 %vm363_vm3, %v854_v30  ;;  %3020 = vmatmul.mubr.msk.f32.vlgmr.msra.gmra.mrb[8].mxu0 %vm363_vm3, %v854_v30 }
 0x22f   :  { %3353 = vmatpush3.bf16.msra.mxu1 %v3815_v6  ;;  %3030 = vmatprep.mubr.msk.f32.mxu1 %vm3556_vm2, %v3554_v7 }
 0x230   :  { %3354 = vmatprep.subr.bf16.mxu1 %v3555_v47  ;;  %3359 = vmatpush3.bf16.msra.mxu0 %v3737_v44 }
 0x231   :  { %3360 = vmatprep.subr.bf16.mxu0 %v3555_v47  ;;  %3041 = vmatprep.mubr.msk.f32.mxu0 %vm3556_vm2, %v3554_v7 }
 0x233   :  { %3356 = vmatpush3.bf16.msra.mxu1 %v3833_v13 }
 0x234   :  { %3363 = vmatprep.subr.bf16.mxu1 %v3555_v47  ;;  %3362 = vmatpush3.bf16.msra.mxu0 %v3757_v51 }
 0x235   :  { %3369 = vmatprep.subr.bf16.mxu0 %v3555_v47 }
 0x236   :  { %3031 = vmatmul.mubr.msk.f32.vlgmr.msra.gmra.mrb[12].mxu1 %vm363_vm3, %v854_v30 }
 0x237   :  { %3365 = vmatpush3.bf16.msra.mxu1 %v3779_v58  ;;  %3052 = vmatprep.mubr.msk.f32.mxu1 %vm3556_vm2, %v3554_v7 }
 0x238   :  { %3366 = vmatprep.subr.bf16.mxu1 %v3555_v47 }
 0x23b   :  { %3368 = vmatpush3.bf16.msra.mxu1 %v3797_v0 }
 0x23c   :  { %3375 = vmatprep.subr.bf16.mxu1 %v3555_v47 }
 0x301   :  { %v923_v31 = vpop.f32.mrb[10].mxu1  ;;  %v993_v32 = vpop.f32.mrb[8].mxu0 }
 0x302   :  { %v1068_v33 = vrot.slane %v923_v31, 4  ;;  %v1078_v34 = vrot.slane %v993_v32, 4  ;;  %v3010_v35 = vpop.f32.mrb[11].mxu1  ;;  %v3021_v36 = vpop.f32.mrb[9].mxu0 }
 0x304   :  { %v1070_v37 = vadd.f32 %v1068_v33, %v3867_v22  ;;  %v1080_v39 = vadd.f32 %v1078_v34, %v3870_v27 }
 0x306   :  { %v2639_v41 = vmul.f32 -1.442695, %v1070_v37  ;;  %v2640_v42 = vmul.f32 -1.442695, %v1080_v39 }
 0x308   :  { %3494 = vpow2.f32 %v2639_v41 }
 0x309   :  { %3496 = vpow2.f32 %v2640_v42  ;;  %v1063_v43 = vpop.f32.mrb[12].mxu1 }
 0x30a   :  { %v3032_v46 = vpop.f32.mrb[13].mxu1  ;;  %v1064_v53 = vadd.f32 %v3881_v40, %v1063_v43 }
 0x30c   :  { %v1088_v54 = vrot.slane %v1064_v53, 4 }
 0x312   :  { %v3495_v48 = vpop.eup %3494 }
 0x313   :  { %v3497_v49 = vpop.eup %3496  ;;  %v1074_v50 = vadd.f32 1.0, %v3495_v48 }
 0x314   :  { %v1084_v52 = vadd.f32 1.0, %v3497_v49 }
 0x315   :  { %3498 = vrcp.f32 %v1074_v50 }
 0x316   :  { %3500 = vrcp.f32 %v1084_v52 }
 0x31f   :  { %v3499_v55 = vpop.eup %3498 }
 0x320   :  { %v3501_v57 = vpop.eup %3500  ;;  %v1090_v59 = vmul.f32 %v3499_v55, %v1088_v54 }
 0x321   :  { %v1097_v60 = vmul.f32 %v3501_v57, %v1095_v56  ;;  %v1093_v62 = vsub.f32 1.0, %v3501_v57 }
 0x322   :  { %v1091_v61 = vadd.f32 %v1090_v59, %v3884_v45 }
 0x324   :  { %3502 = vtanh.f32 %v1091_v61 }
 0x32e   :  { %v3503_v63 = vpop.eup %3502 }
 0x32f   :  { %v1094_v1 = vmul.f32 %v3503_v63, %v1093_v62 }
 0x331   :  { %v1098_v2 = vadd.f32 %v1097_v60, %v1094_v1 }
 0x333   :  { %1100 = vst.msk [vmem:[#allocation3] sm:$0x30] %vm1099_vm5, %v1098_v2  ;;  %v1102_v3 = vrot.slane %v1098_v2, 4  ;;  %v1343_v30 = vrot.slane %v1098_v2, 6 }
 0x335   :  { %3042 = vmatmul.mubr.msk.f32.vlgmr.msra.gmra.mrb[10].mxu0 %vm363_vm3, %v1102_v3  ;;  %3053 = vmatmul.mubr.msk.f32.vlgmr.msra.gmra.mrb[14].mxu1 %vm363_vm3, %v1102_v3 }
 0x336   :  { %3371 = vmatpush3.bf16.msra.mxu0 %v3815_v6  ;;  %3063 = vmatprep.mubr.msk.f32.mxu0 %vm3556_vm2, %v3554_v7 }
 0x337   :  { %3372 = vmatprep.subr.bf16.mxu0 %v3555_v47  ;;  %3377 = vmatpush3.bf16.msra.mxu1 %v3737_v44 }
 0x338   :  { %3378 = vmatprep.subr.bf16.mxu1 %v3555_v47  ;;  %3074 = vmatprep.mubr.msk.f32.mxu1 %vm3556_vm2, %v3554_v7 }
 0x33a   :  { %3374 = vmatpush3.bf16.msra.mxu0 %v3833_v13 }
 0x33b   :  { %3381 = vmatprep.subr.bf16.mxu0 %v3555_v47  ;;  %3380 = vmatpush3.bf16.msra.mxu1 %v3757_v51 }
 0x33c   :  { %3387 = vmatprep.subr.bf16.mxu1 %v3555_v47 }
 0x33d   :  { %3064 = vmatmul.mubr.msk.f32.vlgmr.msra.gmra.mrb[12].mxu0 %vm363_vm3, %v1102_v3 }
 0x33e   :  { %3383 = vmatpush3.bf16.msra.mxu0 %v3779_v58  ;;  %3085 = vmatprep.mubr.msk.f32.mxu0 %vm3556_vm2, %v3554_v7 }
 0x33f   :  { %3384 = vmatprep.subr.bf16.mxu0 %v3555_v47 }
 0x342   :  { %3386 = vmatpush3.bf16.msra.mxu0 %v3797_v0 }
 0x343   :  { %3393 = vmatprep.subr.bf16.mxu0 %v3555_v47 }
 0x408   :  { %v1171_v4 = vpop.f32.mrb[10].mxu0  ;;  %v1241_v5 = vpop.f32.mrb[14].mxu1 }
 0x409   :  { %v1316_v8 = vrot.slane %v1171_v4, 2  ;;  %v1326_v9 = vrot.slane %v1241_v5, 2  ;;  %v3043_v10 = vpop.f32.mrb[11].mxu0  ;;  %v3054_v11 = vpop.f32.mrb[15].mxu1 }
 0x40b   :  { %v1318_v12 = vadd.f32 %v1316_v8, %v3867_v22  ;;  %v1328_v14 = vadd.f32 %v1326_v9, %v3870_v27 }
 0x40d   :  { %v2644_v15 = vmul.f32 -1.442695, %v1318_v12  ;;  %v2645_v16 = vmul.f32 -1.442695, %v1328_v14 }
 0x40f   :  { %3504 = vpow2.f32 %v2644_v15 }
 0x410   :  { %3506 = vpow2.f32 %v2645_v16  ;;  %v1311_v18 = vpop.f32.mrb[12].mxu0 }
 0x411   :  { %v3065_v19 = vpop.f32.mrb[13].mxu0  ;;  %v1312_v26 = vadd.f32 %v3881_v40, %v1311_v18 }
 0x413   :  { %v1336_v28 = vrot.slane %v1312_v26, 2 }
 0x419   :  { %v3505_v21 = vpop.eup %3504 }
 0x41a   :  { %v3507_v23 = vpop.eup %3506  ;;  %v1322_v24 = vadd.f32 1.0, %v3505_v21 }
 0x41b   :  { %v1332_v25 = vadd.f32 1.0, %v3507_v23 }
 0x41c   :  { %3508 = vrcp.f32 %v1322_v24 }
 0x41d   :  { %3510 = vrcp.f32 %v1332_v25 }
 0x426   :  { %v3509_v29 = vpop.eup %3508 }
 0x427   :  { %v3511_v22 = vpop.eup %3510  ;;  %v1338_v31 = vmul.f32 %v3509_v29, %v1336_v28 }
 0x428   :  { %v1345_v27 = vmul.f32 %v3511_v22, %v1343_v30  ;;  %v1341_v33 = vsub.f32 1.0, %v3511_v22 }
 0x429   :  { %v1339_v32 = vadd.f32 %v1338_v31, %v3884_v45 }
 0x42b   :  { %3512 = vtanh.f32 %v1339_v32 }
 0x435   :  { %v3513_v34 = vpop.eup %3512 }
 0x436   :  { %v1342_v35 = vmul.f32 %v3513_v34, %v1341_v33 }
 0x438   :  { %v1346_v36 = vadd.f32 %v1345_v27, %v1342_v35 }
 0x43a   :  { %1348 = vst.msk [vmem:[#allocation3] sm:$0xc0] %vm1347_vm6, %v1346_v36  ;;  %v1350_v37 = vrot.slane %v1346_v36, 6 }
 0x43c   :  { %3075 = vmatmul.mubr.msk.f32.vlgmr.msra.gmra.mrb[16].mxu1 %vm363_vm3, %v1350_v37  ;;  %3086 = vmatmul.mubr.msk.f32.vlgmr.msra.gmra.mrb[14].mxu0 %vm363_vm3, %v1350_v37 }
 0x43d   :  { %3389 = vmatpush3.bf16.msra.mxu1 %v3815_v6  ;;  %3096 = vmatprep.mubr.msk.f32.mxu1 %vm3556_vm2, %v3554_v7 }
 0x43e   :  { %3390 = vmatprep.subr.bf16.mxu1 %v3555_v47  ;;  %3395 = vmatpush3.bf16.msra.mxu0 %v3737_v44 }
 0x43f   :  { %3396 = vmatprep.subr.bf16.mxu0 %v3555_v47  ;;  %3107 = vmatprep.mubr.msk.f32.mxu0 %vm3556_vm2, %v3554_v7 }
 0x441   :  { %3392 = vmatpush3.bf16.msra.mxu1 %v3833_v13 }
 0x442   :  { %3399 = vmatprep.subr.bf16.mxu1 %v3555_v47  ;;  %3398 = vmatpush3.bf16.msra.mxu0 %v3757_v51 }
 0x443   :  { %3405 = vmatprep.subr.bf16.mxu0 %v3555_v47 }
 0x444   :  { %3097 = vmatmul.mubr.msk.f32.vlgmr.msra.gmra.mrb[18].mxu1 %vm363_vm3, %v1350_v37 }
 0x445   :  { %3401 = vmatpush3.bf16.msra.mxu1 %v3779_v58  ;;  %3118 = vmatprep.mubr.msk.f32.mxu1 %vm3556_vm2, %v3554_v7 }
 0x446   :  { %3402 = vmatprep.subr.bf16.mxu1 %v3555_v47 }
 0x449   :  { %3404 = vmatpush3.bf16.msra.mxu1 %v3797_v0 }
 0x44a   :  { %3411 = vmatprep.subr.bf16.mxu1 %v3555_v47 }
 0x50f   :  { %v1419_v45 = vpop.f32.mrb[16].mxu1  ;;  %v1489_v39 = vpop.f32.mrb[14].mxu0 }
 0x510   :  { %v1563_v41 = vadd.f32 %v1419_v45, %v3865_v20  ;;  %v3076_v42 = vpop.f32.mrb[17].mxu1  ;;  %v3087_v43 = vpop.f32.mrb[15].mxu0  ;;  %v1570_v48 = vadd.f32 %v1489_v39, %v3863_v17 }
 0x512   :  { %v2649_v46 = vmul.f32 -1.442695, %v1563_v41  ;;  %v2650_v49 = vmul.f32 -1.442695, %v1570_v48 }
 0x514   :  { %3514 = vpow2.f32 %v2649_v46 }
 0x515   :  { %3516 = vpow2.f32 %v2650_v49 }
 0x517   :  { %v1559_v50 = vpop.f32.mrb[18].mxu1 }
 0x518   :  { %v3098_v52 = vpop.f32.mrb[19].mxu1  ;;  %v1560_v57 = vadd.f32 %v3881_v40, %v1559_v50 }
 0x51e   :  { %v3515_v53 = vpop.eup %3514 }
 0x51f   :  { %v1567_v54 = vadd.f32 1.0, %v3515_v53  ;;  %v3517_v55 = vpop.eup %3516 }
 0x520   :  { %v1574_v56 = vadd.f32 1.0, %v3517_v55 }
 0x521   :  { %3518 = vrcp.f32 %v1567_v54 }
 0x522   :  { %3520 = vrcp.f32 %v1574_v56 }
 0x52b   :  { %v3519_v59 = vpop.eup %3518 }
 0x52c   :  { %v1577_v60 = vmul.f32 %v3519_v59, %v1560_v57  ;;  %v3521_v62 = vpop.eup %3520 }
 0x52d   :  { %v1580_v63 = vsub.f32 1.0, %v3521_v62  ;;  %v1583_v3 = vmul.f32 %v3521_v62, %v1350_v37 }
 0x52e   :  { %v1578_v61 = vadd.f32 %v1577_v60, %v3876_v38 }
 0x530   :  { %3522 = vtanh.f32 %v1578_v61 }
 0x53a   :  { %v3523_v1 = vpop.eup %3522 }
 0x53b   :  { %v1581_v2 = vmul.f32 %v3523_v1, %v1580_v63 }
 0x53d   :  { %v1584_v4 = vadd.f32 %v1583_v3, %v1581_v2 }
 0x53f   :  { %1585 = vst.msk [vmem:[#allocation3 + $0x8] sm:$0x3] %vm56_vm0, %v1584_v4  ;;  %3108 = vmatmul.mubr.msk.f32.vlgmr.msra.gmra.mrb[16].mxu0 %vm363_vm3, %v1584_v4  ;;  %3119 = vmatmul.mubr.msk.f32.vlgmr.msra.gmra.mrb[20].mxu1 %vm363_vm3, %v1584_v4  ;;  %v1827_v22 = vrot.slane %v1584_v4, 6 }
 0x540   :  { %3407 = vmatpush3.bf16.msra.mxu0 %v3815_v6  ;;  %3129 = vmatprep.mubr.msk.f32.mxu0 %vm3556_vm2, %v3554_v7 }
 0x541   :  { %3408 = vmatprep.subr.bf16.mxu0 %v3555_v47  ;;  %3413 = vmatpush3.bf16.msra.mxu1 %v3737_v44 }
 0x542   :  { %3414 = vmatprep.subr.bf16.mxu1 %v3555_v47  ;;  %3140 = vmatprep.mubr.msk.f32.mxu1 %vm3556_vm2, %v3554_v7 }
 0x544   :  { %3410 = vmatpush3.bf16.msra.mxu0 %v3833_v13 }
 0x545   :  { %3417 = vmatprep.subr.bf16.mxu0 %v3555_v47  ;;  %3416 = vmatpush3.bf16.msra.mxu1 %v3757_v51 }
 0x546   :  { %3423 = vmatprep.subr.bf16.mxu1 %v3555_v47 }
 0x547   :  { %3130 = vmatmul.mubr.msk.f32.vlgmr.msra.gmra.mrb[18].mxu0 %vm363_vm3, %v1584_v4 }
 0x548   :  { %3419 = vmatpush3.bf16.msra.mxu0 %v3779_v58  ;;  %3151 = vmatprep.mubr.msk.f32.mxu0 %vm3556_vm2, %v3554_v7 }
 0x549   :  { %3420 = vmatprep.subr.bf16.mxu0 %v3555_v47 }
 0x54c   :  { %3422 = vmatpush3.bf16.msra.mxu0 %v3797_v0 }
 0x54d   :  { %3429 = vmatprep.subr.bf16.mxu0 %v3555_v47 }
 0x612   :  { %v1655_v5 = vpop.f32.mrb[16].mxu0  ;;  %v1725_v8 = vpop.f32.mrb[20].mxu1 }
 0x613   :  { %v1800_v9 = vrot.slane %v1655_v5, 6  ;;  %v1810_v10 = vrot.slane %v1725_v8, 6  ;;  %v3109_v11 = vpop.f32.mrb[17].mxu0  ;;  %v3120_v12 = vpop.f32.mrb[21].mxu1 }
 0x614   :  { %v2330_v11 = vld [vmem:[%s4120_s11 + $0x8] sm:$0xff]  ;;  %v2420_v12 = vld [vmem:[%s4121_s12] sm:$0xff] }
 0x615   :  { %v1802_v14 = vadd.f32 %v1800_v9, %v3865_v20  ;;  %v1812_v15 = vadd.f32 %v1810_v10, %v3863_v17  ;;  %v2327_v9 = vld [vmem:[#allocation3] sm:$0xff] }
 0x616   :  { %v2329_v10 = vld [vmem:[%s4120_s11] sm:$0xff] }
 0x617   :  { %v2654_v16 = vmul.f32 -1.442695, %v1802_v14  ;;  %v2655_v18 = vmul.f32 -1.442695, %v1812_v15  ;;  %v2421_v14 = vld [vmem:[%s4121_s12 + $0x8] sm:$0xff] }
 0x618   :  { %v3455_v15 = vpack.c.bf16 %v2421_v14, %v2420_v12 }
 0x619   :  { %3524 = vpow2.f32 %v2654_v16 }
 0x61a   :  { %3526 = vpow2.f32 %v2655_v18  ;;  %v1795_v19 = vpop.f32.mrb[18].mxu0 }
 0x61b   :  { %v3131_v21 = vpop.f32.mrb[19].mxu0  ;;  %v1796_v28 = vadd.f32 %v3881_v40, %v1795_v19 }
 0x61d   :  { %v1820_v29 = vrot.slane %v1796_v28, 6 }
 0x623   :  { %v3525_v23 = vpop.eup %3524 }
 0x624   :  { %v3527_v24 = vpop.eup %3526  ;;  %v1806_v25 = vadd.f32 1.0, %v3525_v23 }
 0x625   :  { %v1816_v26 = vadd.f32 1.0, %v3527_v24 }
 0x626   :  { %3528 = vrcp.f32 %v1806_v25 }
 0x627   :  { %3530 = vrcp.f32 %v1816_v26 }
 0x630   :  { %v3529_v30 = vpop.eup %3528 }
 0x631   :  { %v3531_v31 = vpop.eup %3530  ;;  %v1822_v27 = vmul.f32 %v3529_v30, %v1820_v29 }
 0x632   :  { %v1829_v32 = vmul.f32 %v3531_v31, %v1827_v22  ;;  %v1825_v34 = vsub.f32 1.0, %v3531_v31 }
 0x633   :  { %v1823_v33 = vadd.f32 %v1822_v27, %v3876_v38 }
 0x635   :  { %3532 = vtanh.f32 %v1823_v33 }
 0x63f   :  { %v3533_v35 = vpop.eup %3532 }
 0x640   :  { %v1826_v36 = vmul.f32 %v3533_v35, %v1825_v34 }
 0x642   :  { %v1830_v37 = vadd.f32 %v1829_v32, %v1826_v36 }
 0x644   :  { %1831 = vst.msk [vmem:[#allocation3 + $0x8] sm:$0xc] %vm851_vm4, %v1830_v37  ;;  %v1833_v45 = vrot.slane %v1830_v37, 2  ;;  %v2074_v60 = vrot.slane %v1830_v37, 6 }
 0x646   :  { %3141 = vmatmul.mubr.msk.f32.vlgmr.msra.gmra.mrb[22].mxu1 %vm363_vm3, %v1833_v45  ;;  %3152 = vmatmul.mubr.msk.f32.vlgmr.msra.gmra.mrb[20].mxu0 %vm363_vm3, %v1833_v45 }
 0x647   :  { %3425 = vmatpush3.bf16.msra.mxu1 %v3815_v6  ;;  %3162 = vmatprep.mubr.msk.f32.mxu1 %vm3556_vm2, %v3554_v7 }
 0x648   :  { %3426 = vmatprep.subr.bf16.mxu1 %v3555_v47  ;;  %3431 = vmatpush3.bf16.msra.mxu0 %v3737_v44 }
 0x649   :  { %3432 = vmatprep.subr.bf16.mxu0 %v3555_v47  ;;  %3173 = vmatprep.mubr.msk.f32.mxu0 %vm3556_vm2, %v3554_v7 }
 0x64b   :  { %3428 = vmatpush3.bf16.msra.mxu1 %v3833_v13 }
 0x64c   :  { %3435 = vmatprep.subr.bf16.mxu1 %v3555_v47  ;;  %3434 = vmatpush3.bf16.msra.mxu0 %v3757_v51 }
 0x64d   :  { %3441 = vmatprep.subr.bf16.mxu0 %v3555_v47 }
 0x64e   :  { %3163 = vmatmul.mubr.msk.f32.vlgmr.msra.gmra.mrb[24].mxu1 %vm363_vm3, %v1833_v45 }
 0x64f   :  { %3437 = vmatpush3.bf16.msra.mxu1 %v3779_v58  ;;  %3184 = vmatprep.mubr.msk.f32.mxu1 %vm3556_vm2, %v3554_v7 }
 0x650   :  { %3438 = vmatprep.subr.bf16.mxu1 %v3555_v47 }
 0x653   :  { %3440 = vmatpush3.bf16.msra.mxu1 %v3797_v0 }
 0x719   :  { %v1902_v44 = vpop.f32.mrb[22].mxu1  ;;  %v1972_v39 = vpop.f32.mrb[20].mxu0 }
 0x71a   :  { %v2047_v41 = vrot.slane %v1902_v44, 4  ;;  %v2057_v42 = vrot.slane %v1972_v39, 4  ;;  %v3142_v43 = vpop.f32.mrb[23].mxu1  ;;  %v3153_v46 = vpop.f32.mrb[21].mxu0 }
 0x71c   :  { %v2049_v51 = vadd.f32 %v2047_v41, %v3865_v20  ;;  %v2059_v48 = vadd.f32 %v2057_v42, %v3863_v17 }
 0x71e   :  { %v2659_v49 = vmul.f32 -1.442695, %v2049_v51  ;;  %v2660_v50 = vmul.f32 -1.442695, %v2059_v48  ;;  %v2511_v48 = vld [vmem:[%s4122_s13] sm:$0xff] }
 0x720   :  { %3534 = vpow2.f32 %v2659_v49  ;;  %v2512_v49 = vld [vmem:[%s4122_s13 + $0x8] sm:$0xff] }
 0x721   :  { %3536 = vpow2.f32 %v2660_v50  ;;  %v2042_v58 = vpop.f32.mrb[24].mxu1  ;;  %v3463_v50 = vpack.c.bf16 %v2512_v49, %v2511_v48 }
 0x722   :  { %v3164_v52 = vpop.f32.mrb[25].mxu1  ;;  %v2043_v56 = vadd.f32 %v3881_v40, %v2042_v58 }
 0x724   :  { %v2067_v57 = vrot.slane %v2043_v56, 4  ;;  %v2513_v56 = vld [vmem:[%s4122_s13 + $0x10] sm:$0xff] }
 0x72a   :  { %v3535_v53 = vpop.eup %3534 }
 0x72b   :  { %v3537_v54 = vpop.eup %3536  ;;  %v2053_v55 = vadd.f32 1.0, %v3535_v53 }
 0x72c   :  { %v2063_v0 = vadd.f32 1.0, %v3537_v54 }
 0x72d   :  { %3538 = vrcp.f32 %v2053_v55 }
 0x72e   :  { %3540 = vrcp.f32 %v2063_v0 }
 0x737   :  { %v3539_v59 = vpop.eup %3538 }
 0x738   :  { %v3541_v61 = vpop.eup %3540  ;;  %v2069_v62 = vmul.f32 %v3539_v59, %v2067_v57  ;;  %v2514_v57 = vld [vmem:[%s4122_s13 + $0x18] sm:$0xff] }
 0x739   :  { %v2076_v63 = vmul.f32 %v3541_v61, %v2074_v60  ;;  %v2072_v2 = vsub.f32 1.0, %v3541_v61  ;;  %v3467_v59 = vpack.c.bf16 %v2514_v57, %v2513_v56  ;;  %v20_v60 = vstv %s4123_s14 }
 0x73a   :  { %v2070_v1 = vadd.f32 %v2069_v62, %v3876_v38  ;;  %21 = vst [vmem:[#allocation4] sm:$0x1] %v20_v60 }
 0x73c   :  { %3542 = vtanh.f32 %v2070_v1 }
 0x746   :  { %v3543_v3 = vpop.eup %3542 }
 0x747   :  { %v2073_v4 = vmul.f32 %v3543_v3, %v2072_v2 }
 0x749   :  { %v2077_v5 = vadd.f32 %v2076_v63, %v2073_v4  ;;  %v2670_v4 = vld [vmem:[#allocation4] ss:$0 sm:$0xff] }
 0x74b   :  { %2078 = vst.msk [vmem:[#allocation3 + $0x8] sm:$0x30] %vm1099_vm5, %v2077_v5  ;;  %v2080_v8 = vrot.slane %v2077_v5, 4  ;;  %v2321_v37 = vrot.slane %v2077_v5, 6 }
 0x74d   :  { %3174 = vmatmul.mubr.msk.f32.vlgmr.msra.gmra.mrb[22].mxu0 %vm363_vm3, %v2080_v8  ;;  %3185 = vmatmul.mubr.msk.f32.vlgmr.msra.gmra.mrb[26].mxu1 %vm363_vm3, %v2080_v8 }
 0x74e   :  { %3443 = vmatpush3.bf16.msra.mxu0 %v3815_v6  ;;  %3206 = vmatprep.mubr.msk.f32.mxu1 %vm363_vm3, %v2327_v9  ;;  %v3447_v6 = vpack.c.bf16 %v2330_v11, %v2329_v10 }
 0x74f   :  { %3444 = vmatprep.subr.bf16.mxu0 %v3555_v47  ;;  %3195 = vmatprep.mubr.msk.f32.mxu0 %vm3556_vm2, %v3554_v7  ;;  %v2331_v47 = vld [vmem:[%s4120_s11 + $0x10] sm:$0xff]  ;;  %v2332_v7 = vld [vmem:[%s4120_s11 + $0x18] sm:$0xff] }
 0x750   :  { %3448 = vmatprep.subr.bf16.mxu1 %v3447_v6 }
 0x751   :  { %3450 = vmatpush3.bf16.msra.mxu1 %v3447_v6 }
 0x752   :  { %3446 = vmatpush3.bf16.msra.mxu0 %v3833_v13  ;;  %v3451_v13 = vpack.c.bf16 %v2332_v7, %v2331_v47 }
 0x753   :  { %3456 = vmatprep.subr.bf16.mxu0 %v3455_v15 }
 0x754   :  { %3452 = vmatprep.subr.bf16.mxu1 %v3451_v13 }
 0x755   :  { %3196 = vmatmul.mubr.msk.f32.vlgmr.msra.gmra.mrb[24].mxu0 %vm363_vm3, %v2080_v8  ;;  %3454 = vmatpush3.bf16.msra.mxu1 %v3451_v13 }
 0x756   :  { %3458 = vmatpush3.bf16.msra.mxu0 %v3455_v15  ;;  %3464 = vmatprep.subr.bf16.mxu1 %v3463_v50 }
 0x820   :  { %v2149_v16 = vpop.f32.mrb[22].mxu0  ;;  %v2219_v18 = vpop.f32.mrb[26].mxu1 }
 0x821   :  { %v2294_v19 = vrot.slane %v2149_v16, 2  ;;  %v2304_v21 = vrot.slane %v2219_v18, 2  ;;  %v3175_v23 = vpop.f32.mrb[23].mxu0  ;;  %v3186_v24 = vpop.f32.mrb[27].mxu1 }
 0x823   :  { %v2296_v25 = vadd.f32 %v2294_v19, %v3865_v20  ;;  %v2306_v26 = vadd.f32 %v2304_v21, %v3863_v17 }
 0x825   :  { %v2664_v28 = vmul.f32 -1.442695, %v2296_v25  ;;  %v2665_v29 = vmul.f32 -1.442695, %v2306_v26 }
 0x827   :  { %3544 = vpow2.f32 %v2664_v28 }
 0x828   :  { %3546 = vpow2.f32 %v2665_v29  ;;  %v2289_v30 = vpop.f32.mrb[24].mxu0 }
 0x829   :  { %v3197_v22 = vpop.f32.mrb[25].mxu0  ;;  %v2290_v34 = vadd.f32 %v3881_v40, %v2289_v30  ;;  %v2422_v40 = vld [vmem:[%s4121_s12 + $0x10] sm:$0xff] }
 0x82b   :  { %v2314_v35 = vrot.slane %v2290_v34, 2 }
 0x831   :  { %v3545_v31 = vpop.eup %3544 }
 0x832   :  { %v3547_v27 = vpop.eup %3546  ;;  %v2300_v32 = vadd.f32 1.0, %v3545_v31 }
 0x833   :  { %v2310_v33 = vadd.f32 1.0, %v3547_v27 }
 0x834   :  { %3548 = vrcp.f32 %v2300_v32 }
 0x835   :  { %3550 = vrcp.f32 %v2310_v33 }
 0x83e   :  { %v3549_v36 = vpop.eup %3548 }
 0x83f   :  { %v3551_v20 = vpop.eup %3550  ;;  %v2316_v45 = vmul.f32 %v3549_v36, %v2314_v35 }
 0x840   :  { %v2323_v17 = vmul.f32 %v3551_v20, %v2321_v37  ;;  %v2319_v39 = vsub.f32 1.0, %v3551_v20 }
 0x841   :  { %v2317_v44 = vadd.f32 %v2316_v45, %v3876_v38  ;;  %v2423_v38 = vld [vmem:[%s4121_s12 + $0x18] sm:$0xff] }
 0x842   :  { %v3459_v51 = vpack.c.bf16 %v2423_v38, %v2422_v40 }
 0x843   :  { %3552 = vtanh.f32 %v2317_v44 }
 0x844   :  { %3460 = vmatprep.subr.bf16.mxu0 %v3459_v51 }
 0x845   :  { %3462 = vmatpush3.bf16.msra.mxu0 %v3459_v51 }
 0x84d   :  { %v3553_v41 = vpop.eup %3552 }
 0x84e   :  { %v2320_v42 = vmul.f32 %v3553_v41, %v2319_v39 }
 0x850   :  { %v2324_v43 = vadd.f32 %v2323_v17, %v2320_v42 }
 0x852   :  { %2325 = vst.msk [vmem:[#allocation3 + $0x8] sm:$0xc0] %vm1347_vm6, %v2324_v43  ;;  %2326 = vst.msk [vmem:[#allocation2 - $0x6] sm:$0xc0] %vm1347_vm6, %v2324_v43 }
 0x859   :  { %v2328_v46 = vld [vmem:[#allocation3 + $0x8] sm:$0xff] }
 0x85a   :  { %3207 = vmatmul.mubr.msk.f32.vlgmr.msra.gmra.mrb[28].mxu1 %vm363_vm3, %v2328_v46 }
 0x85b   :  { %3466 = vmatpush3.bf16.msra.mxu1 %v3463_v50 }
 0x85c   :  { %3468 = vmatprep.subr.bf16.mxu1 %v3467_v59 }
 0x85f   :  { %3470 = vmatpush3.bf16.msra.mxu1 %v3467_v59 }
 0x92d   :  { %v3208_v58 = vpop.f32.mrb[28].mxu1 }
 0x92e   :  { %v2417_v52 = vmul.f32 0.01, %v3208_v58  ;;  %v2405_v53 = vpop.f32.mrb[29].mxu1  ;;  %vm2415_vm7 = vcmp.gt.f32.partialorder %v3208_v58, 0.0 }
 0x92f   :  { %vm2414_vm8 = vcmp.gt.f32.partialorder %v2405_v53, 0.0  ;;  %v2416_v54 = vmul.f32 0.01, %v2405_v53 }
 0x930   :  { %v2419_v0 = vsel %vm2415_vm7, %v3208_v58, %v2417_v52 }
 0x931   :  { %v2418_v55 = vsel %vm2414_vm8, %v2405_v53, %v2416_v54 }
 0x932   :  { %3217 = vmatprep.mubr.msk.f32.mxu0 %vm363_vm3, %v2418_v55 }
 0x933   :  { %3218 = vmatmul.mubr.msk.f32.vlgmr.msra.gmra.mrb[26].mxu0 %vm363_vm3, %v2419_v0 }
 0xa06   :  { %v3219_v61 = vpop.f32.mrb[26].mxu0 }
 0xa07   :  { %v2508_v62 = vmul.f32 0.01, %v3219_v61  ;;  %v2496_v63 = vpop.f32.mrb[27].mxu0  ;;  %vm2506_vm9 = vcmp.gt.f32.partialorder %v3219_v61, 0.0 }
 0xa08   :  { %vm2505_vm10 = vcmp.gt.f32.partialorder %v2496_v63, 0.0  ;;  %v2507_v1 = vmul.f32 0.01, %v2496_v63 }
 0xa09   :  { %v2510_v3 = vsel %vm2506_vm9, %v3219_v61, %v2508_v62 }
 0xa0a   :  { %v2509_v2 = vsel %vm2505_vm10, %v2496_v63, %v2507_v1 }
 0xa0b   :  { %3228 = vmatprep.mubr.msk.f32.mxu1 %vm363_vm3, %v2509_v2 }
 0xa0c   :  { %3229 = vmatmul.mubr.msk.f32.vlgmr.msra.gmra.mrb[30].mxu1 %vm363_vm3, %v2510_v3 }
 0xadf   :  { %v3230_v5 = vpop.f32.mrb[30].mxu1 }
 0xae0   :  { %v2600_v8 = vadd.f32 %v3230_v5, %v2670_v4  ;;  %v2594_v9 = vpop.f32.mrb[31].mxu1 }
 0xae1   :  { %v2595_v10 = vadd.f32 %v2670_v4, %v2594_v9 }
 0xae2   :  { %vm2604_vm11 = vcmp.gt.f32.partialorder %v2600_v8, 0.0  ;;  %v2606_v11 = vmul.f32 0.01, %v2600_v8 }
 0xae3   :  { %vm2603_vm13 = vcmp.gt.f32.partialorder %v2595_v10, 0.0  ;;  %v2605_v6 = vmul.f32 0.01, %v2595_v10 }
 0xae4   :  { %v2608_v47 = vsel %vm2604_vm11, %v2600_v8, %v2606_v11 }
 0xae5   :  { %2611 = vst.msk [vmem:[%s4124_s15 + $0x8] sm:$0xff] %vm2609_vm12, %v2608_v47  ;;  %v2607_v7 = vsel %vm2603_vm13, %v2595_v10, %v2605_v6 }
 0xae6   :  { %2610 = vst.msk [vmem:[%s4124_s15] sm:$0xff] %vm2609_vm12, %v2607_v7 }

</bundles_post_ra>
